<compile_context>
chip_gen: v7x
topology: tpu7x:2x2x1
jax: 0.10.0
libtpu: 0.0.40
codegen_flags: <defaults>
</compile_context>

<pallas_src>
import functools
import math

import jax
import jax.numpy as jnp
from jax.experimental import pallas as pl
from jax.experimental.pallas import tpu as pltpu


# ----------------------------- kernel ----------------------------------------


def _layer_norm(x, g, b, eps=1e-12):
    mu = jnp.mean(x, axis=-1, keepdims=True)
    var = jnp.mean(jnp.square(x - mu), axis=-1, keepdims=True)
    return (x - mu) * jax.lax.rsqrt(var + eps) * g + b


def albert_kernel(*refs, num_layers, num_heads, pool):
    """One grid step processes a tile of Bt batch elements.

    refs:
      emb_ref   : (Bt*S, E) f32   summed word+pos+type embeddings (rows flattened)
      mask_ref  : (Bt, 1, S) f32  additive attention-mask bias
      [idx_ref] : (Bt, T, K) i32  subword-recovery indices (only if pool=True)
      16 shared-layer weight refs (ALBERT shares ONE layer's params across depth)
      out_ref   : (Bt*S, H) f32 encoded rows      (pool=False)
                  (Bt*T, H) f32 avg-pooled tokens (pool=True)
    """
    emb_ref, mask_ref = refs[0], refs[1]
    off = 3 if pool else 2
    idx_ref = refs[2] if pool else None
    (ln_e_g_ref, ln_e_b_ref, w_proj_ref, b_proj_ref,
     w_qkv_ref, b_qkv_ref, wo_ref, bo_ref,
     ln_a_g_ref, ln_a_b_ref,
     w_ffn_ref, b_ffn_ref, w_ffo_ref, b_ffo_ref,
     ln_o_g_ref, ln_o_b_ref) = refs[off:off + 16]
    out_ref = refs[off + 16]

    Bt = mask_ref.shape[0]
    S = mask_ref.shape[2]
    H = w_proj_ref.shape[1]
    hd = H // num_heads
    scale = 1.0 / math.sqrt(hd)
    bf16 = jnp.bfloat16

    # ---- hoist all parameter loads out of the layer loop (loaded once) ------
    g_e, b_e = ln_e_g_ref[...], ln_e_b_ref[...]
    w_proj, b_proj = w_proj_ref[...], b_proj_ref[...]
    w_qkv, b_qkv = w_qkv_ref[...], b_qkv_ref[...]      # (H, 3H) bf16 / (1, 3H) f32
    wo, bo = wo_ref[...], bo_ref[...]                  # (nh, hd, H) bf16 / (1, H) f32
    g_a, b_a = ln_a_g_ref[...], ln_a_b_ref[...]
    w_ffn, b_ffn = w_ffn_ref[...], b_ffn_ref[...]
    w_ffo, b_ffo = w_ffo_ref[...], b_ffo_ref[...]
    g_o, b_o = ln_o_g_ref[...], ln_o_b_ref[...]

    # Mask bias materialized ONCE (hoisted out of head/layer loops).
    mbias = jnp.broadcast_to(mask_ref[...], (Bt, S, S))           # (Bt, S, S) f32

    # ---- ALBERT embeddings: LayerNorm + factorized E->H projection ----------
    x = _layer_norm(emb_ref[...], g_e, b_e)                       # (Bt*S, E) f32
    h = jnp.dot(x.astype(bf16), w_proj,
                preferred_element_type=jnp.float32) + b_proj      # (Bt*S, H) f32

    # ---- shared transformer layer, iterated num_layers times ----------------
    def layer(_, h):
        h_bf = h.astype(bf16)
        # Fused lane-dense QKV projection: one (Bt*S, H) x (H, 3H) matmul instead of
        # 3*num_heads narrow (N=hd) matmuls.
        qkv = jnp.dot(h_bf, w_qkv, preferred_element_type=jnp.float32) + b_qkv  # (Bt*S, 3H)

        # TODO(synk): the per-head score/PV matmuls are hd-wide by construction; with many
        # heads (ALBERT-base nh=12) a lax.fori_loop over heads would bound live ranges,
        # but that needs dynamic lane-slicing of `qkv`, so keep a static loop here.
        # TODO(synk): fusing the output projection into one (H, H) matmul needs a lane-dim
        # concatenate of the per-head contexts; kept as a per-head accumulation
        # (mathematically identical) for guaranteed lowering.
        attn = None
        for hh in range(num_heads):
            q = (qkv[:, hh * hd:(hh + 1) * hd] * scale).reshape(Bt, S, hd).astype(bf16)
            k = qkv[:, H + hh * hd:H + (hh + 1) * hd].reshape(Bt, S, hd).astype(bf16)
            v = qkv[:, 2 * H + hh * hd:2 * H + (hh + 1) * hd].reshape(Bt, S, hd).astype(bf16)
            s = jnp.einsum("bqd,bkd->bqk", q, k,
                           preferred_element_type=jnp.float32) + mbias
            s = s - jnp.max(s, axis=-1, keepdims=True)
            p = jnp.exp(s)
            denom = jnp.sum(p, axis=-1, keepdims=True)            # (Bt, S, 1)
            ctx = jnp.einsum("bqk,bkd->bqd", p.astype(bf16), v,
                             preferred_element_type=jnp.float32)
            ctx = ctx / denom                  # deferred, exact softmax normalization
            part = jnp.dot(ctx.reshape(Bt * S, hd).astype(bf16), wo[hh],
                           preferred_element_type=jnp.float32)
            attn = part if attn is None else attn + part          # == concat(ctx) @ Wo
        h = _layer_norm(attn + bo + h, g_a, b_a)
        f = jnp.dot(h.astype(bf16), w_ffn, preferred_element_type=jnp.float32) + b_ffn
        f = jax.nn.gelu(f, approximate=True)                      # ALBERT "gelu_new"
        f = jnp.dot(f.astype(bf16), w_ffo, preferred_element_type=jnp.float32) + b_ffo
        return _layer_norm(f + h, g_o, b_o)

    h = jax.lax.fori_loop(0, num_layers, layer, h)                # (Bt*S, H) f32

    if not pool:
        out_ref[...] = h
        return

    # ---- fused, batch-vectorized average-pooling epilogue -------------------
    T, K = idx_ref.shape[1], idx_ref.shape[2]
    idx = idx_ref[...]                                            # (Bt, T, K); 0 == pad
    col = jax.lax.broadcasted_iota(jnp.int32, (Bt, T, S), 2)
    sel = jnp.zeros((Bt, T, S), jnp.float32)
    cnt = jnp.zeros((Bt, T, 1), jnp.float32)
    for kk in range(K):                       # K = subwords per token, tiny & static
        ck = idx[:, :, kk:kk + 1]                                 # (Bt, T, 1)
        valid = ck != 0
        sel = sel + jnp.where(jnp.logical_and(ck == col, valid), 1.0, 0.0)
        cnt = cnt + valid.astype(jnp.float32)
    summed = jnp.einsum("bts,bsh->bth", sel, h.reshape(Bt, S, H),
                        preferred_element_type=jnp.float32)       # one batched MXU matmul
    pooled = summed / jnp.maximum(cnt, 1.0)                       # divisor = max(count, 1)
    out_ref[...] = pooled.reshape(Bt * T, H)                      # single lane-dense store


# ----------------------------- wrappers ---------------------------------------


def _pick_batch_tile(B, S, target_rows=256):
    """Largest divisor of B with Bt*S <= target_rows, while keeping >= 2 grid steps
    (megacore sharding on v7x) whenever B >= 2."""
    cap = max(1, target_rows // S)
    if B >= 2:
        cap = min(cap, B // 2)
    best = 1
    for d in range(1, B + 1):
        if B % d == 0 and d <= cap:
            best = d
    return best


def _weight_spec(arr):
    # Grid-invariant weights: single-buffer them; double-buffering buys nothing and at
    # real ALBERT sizes doubles ~14 MB of resident weight VMEM.
    nd = arr.ndim
    return pl.BlockSpec(arr.shape, lambda b, _nd=nd: (0,) * _nd,
                        pipeline_mode=pl.Buffered(1))


def _prep_weights(params, num_heads):
    """Host-side (free) weight re-layout: fused QKV, per-head-split Wo, bf16 matmul weights."""
    bf16 = jnp.bfloat16
    H = params["w_proj"].shape[1]
    hd = H // num_heads
    w_qkv = jnp.concatenate([params["wq"], params["wk"], params["wv"]], axis=1).astype(bf16)
    b_qkv = jnp.concatenate([params["bq"], params["bk"], params["bv"]], axis=1).astype(jnp.float32)
    wo = params["wo"].reshape(num_heads, hd, H).astype(bf16)
    return [
        params["ln_e_g"], params["ln_e_b"],
        params["w_proj"].astype(bf16), params["b_proj"],
        w_qkv, b_qkv, wo, params["bo"],
        params["ln_a_g"], params["ln_a_b"],
        params["w_ffn"].astype(bf16), params["b_ffn"],
        params["w_ffo"].astype(bf16), params["b_ffo"],
        params["ln_o_g"], params["ln_o_b"],
    ]


def _vmem_limit_bytes(weights, Bt, S, E, H, I, T, K, pool):
    """Explicit VMEM budget: single-buffered weights + double-buffered I/O blocks +
    a generous in-kernel activation estimate, clamped under the per-core capacity."""
    f32, bf = 4, 2
    weight_bytes = sum(int(w.size) * w.dtype.itemsize for w in weights)
    rows = Bt * S
    out_rows = Bt * (T if pool else S)
    io_bytes = 2 * (rows * E * f32 + Bt * S * f32 + out_rows * H * f32
                    + (Bt * T * K * 4 if pool else 0))
    act_bytes = (rows * (E * f32 + 3 * H * (f32 + bf) + 6 * H * f32 + I * (f32 + bf))
                 + Bt * S * S * 3 * f32)                       # scores / probs / mask bias
    if pool:
        act_bytes += Bt * T * (S + H) * f32
    budget = weight_bytes + io_bytes + int(1.5 * act_bytes) + (4 << 20)
    ceiling = 64 << 20                                         # safe fallback (v7x: 64 MiB/TC)
    try:
        cap = int(pltpu.get_tpu_info().vmem_capacity_bytes)    # 128 MiB v5e/v6e, 64 MiB/TC v7x
        ceiling = max(int(0.85 * cap), 16 << 20)
    except Exception:
        pass
    return int(min(max(budget, 32 << 20), ceiling))


def seq2seq_albert_encoder_forward(params, input_ids, token_type_ids=None,
                                   attention_mask=None, token_recovery_matrix=None,
                                   *, num_layers=2, num_heads=4, batch_tile=None):
    B, S = input_ids.shape
    E = params["word_emb"].shape[1]
    H = params["w_proj"].shape[1]
    I = params["w_ffn"].shape[1]

    if token_type_ids is None:
        token_type_ids = jnp.zeros_like(input_ids)
    if attention_mask is None:
        attention_mask = jnp.ones_like(input_ids)

    # Embedding table gathers + flattening are glue; done in plain JAX outside the kernel.
    emb = (params["word_emb"][input_ids]
           + params["pos_emb"][:S][None, :, :]
           + params["type_emb"][token_type_ids]).astype(jnp.float32)
    emb_flat = emb.reshape(B * S, E)
    mask_bias = ((1.0 - attention_mask.astype(jnp.float32)) * -10000.0)[:, None, :]  # (B,1,S)

    weights = _prep_weights(params, num_heads)

    if batch_tile is None:
        batch_tile = _pick_batch_tile(B, S)
    Bt = batch_tile
    assert B % Bt == 0
    grid = (B // Bt,)

    pool = token_recovery_matrix is not None
    if pool:
        idx = token_recovery_matrix.astype(jnp.int32)
        _, T, K = idx.shape
    else:
        T = K = 0

    kernel = functools.partial(albert_kernel, num_layers=num_layers,
                               num_heads=num_heads, pool=pool)

    in_specs = [pl.BlockSpec((Bt * S, E), lambda b: (b, 0)),
                pl.BlockSpec((Bt, 1, S), lambda b: (b, 0, 0))]
    inputs = [emb_flat, mask_bias]
    if pool:
        in_specs.append(pl.BlockSpec((Bt, T, K), lambda b: (b, 0, 0)))
        inputs.append(idx)
        out_shape = jax.ShapeDtypeStruct((B * T, H), jnp.float32)
        out_spec = pl.BlockSpec((Bt * T, H), lambda b: (b, 0))
    else:
        out_shape = jax.ShapeDtypeStruct((B * S, H), jnp.float32)
        out_spec = pl.BlockSpec((Bt * S, H), lambda b: (b, 0))

    in_specs += [_weight_spec(w) for w in weights]
    inputs += weights

    vmem_limit = _vmem_limit_bytes(weights, Bt, S, E, H, I, T, K, pool)

    out = pl.pallas_call(
        kernel,
        out_shape=out_shape,
        grid=grid,
        in_specs=in_specs,
        out_specs=out_spec,
        compiler_params=pltpu.CompilerParams(
            dimension_semantics=("parallel",),     # batch tiles shard across v7x's 2 TCs
            vmem_limit_bytes=vmem_limit),
    )(*inputs)

    if pool:
        return out.reshape(B, T, H)
    return out.reshape(B, S, H)


# ----------------------------- params -----------------------------------------


def init_params(key, *, vocab=50, E=16, H=32, I=64, max_pos=64, type_vocab=2):
    ks = jax.random.split(key, 12)
    s = 0.02
    return {
        "word_emb": s * jax.random.normal(ks[0], (vocab, E), jnp.float32),
        "pos_emb":  s * jax.random.normal(ks[1], (max_pos, E), jnp.float32),
        "type_emb": s * jax.random.normal(ks[2], (type_vocab, E), jnp.float32),
        "ln_e_g": jnp.ones((1, E), jnp.float32),
        "ln_e_b": jnp.zeros((1, E), jnp.float32),
        "w_proj": s * jax.random.normal(ks[3], (E, H), jnp.float32),
        "b_proj": jnp.zeros((1, H), jnp.float32),
        "wq": s * jax.random.normal(ks[4], (H, H), jnp.float32),
        "bq": jnp.zeros((1, H), jnp.float32),
        "wk": s * jax.random.normal(ks[5], (H, H), jnp.float32),
        "bk": jnp.zeros((1, H), jnp.float32),
        "wv": s * jax.random.normal(ks[6], (H, H), jnp.float32),
        "bv": jnp.zeros((1, H), jnp.float32),
        "wo": s * jax.random.normal(ks[7], (H, H), jnp.float32),
        "bo": jnp.zeros((1, H), jnp.float32),
        "ln_a_g": jnp.ones((1, H), jnp.float32),
        "ln_a_b": jnp.zeros((1, H), jnp.float32),
        "w_ffn": s * jax.random.normal(ks[8], (H, I), jnp.float32),
        "b_ffn": jnp.zeros((1, I), jnp.float32),
        "w_ffo": s * jax.random.normal(ks[9], (I, H), jnp.float32),
        "b_ffo": jnp.zeros((1, H), jnp.float32),
        "ln_o_g": jnp.ones((1, H), jnp.float32),
        "ln_o_b": jnp.zeros((1, H), jnp.float32),
    }


# ----------------------------- main --------------------------------------------


if __name__ == "__main__":
    B, S, T, K = 2, 16, 8, 3
    VOCAB, E, H, I = 50, 16, 32, 64
    NUM_LAYERS, NUM_HEADS = 2, 4

    key = jax.random.PRNGKey(0)
    k_param, k_ids, k_type, k_rec = jax.random.split(key, 4)

    params = init_params(k_param, vocab=VOCAB, E=E, H=H, I=I)

    input_ids = jax.random.randint(k_ids, (B, S), 1, VOCAB, dtype=jnp.int32)
    token_type_ids = jax.random.randint(k_type, (B, S), 0, 2, dtype=jnp.int32)
    attention_mask = jnp.ones((B, S), jnp.int32).at[:, S - 2:].set(0)
    # subword indices into the S positions; 0 == padding (matching the PyTorch module's
    # convention, which also conflates sequence position 0 with pad)
    token_recovery_matrix = jax.random.randint(k_rec, (B, T, K), 0, S, dtype=jnp.int32)

    # Path 1: no recovery matrix -> raw encoded layers [B, S, H]
    encoded = seq2seq_albert_encoder_forward(
        params, input_ids, token_type_ids, attention_mask,
        num_layers=NUM_LAYERS, num_heads=NUM_HEADS)
    encoded = jax.block_until_ready(encoded)
    assert encoded.shape == (B, S, H)
    assert bool(jnp.all(jnp.isfinite(encoded)))

    # Path 2: with recovery matrix -> average-pooled token reprs [B, T, H]
    # (pooling is fused into the encoder kernel epilogue; no [B,S,H] HBM round trip)
    pooled = seq2seq_albert_encoder_forward(
        params, input_ids, token_type_ids, attention_mask, token_recovery_matrix,
        num_layers=NUM_LAYERS, num_heads=NUM_HEADS)
    pooled = jax.block_until_ready(pooled)
    assert pooled.shape == (B, T, H)
    assert bool(jnp.all(jnp.isfinite(pooled)))

    print("KERNEL_OK")
</pallas_src>

<mosaic_0001>
module attributes {stable_mosaic.version = 11 : i64} {
  func.func @albert_kernel(%arg0: i32, %arg1: memref<16x16xf32, #tpu.memory_space<vmem>>, %arg2: memref<1x1x16xf32, #tpu.memory_space<vmem>>, %arg3: memref<1x16xf32, #tpu.memory_space<vmem>>, %arg4: memref<1x16xf32, #tpu.memory_space<vmem>>, %arg5: memref<16x32xbf16, #tpu.memory_space<vmem>>, %arg6: memref<1x32xf32, #tpu.memory_space<vmem>>, %arg7: memref<32x96xbf16, #tpu.memory_space<vmem>>, %arg8: memref<1x96xf32, #tpu.memory_space<vmem>>, %arg9: memref<4x8x32xbf16, #tpu.memory_space<vmem>>, %arg10: memref<1x32xf32, #tpu.memory_space<vmem>>, %arg11: memref<1x32xf32, #tpu.memory_space<vmem>>, %arg12: memref<1x32xf32, #tpu.memory_space<vmem>>, %arg13: memref<32x64xbf16, #tpu.memory_space<vmem>>, %arg14: memref<1x64xf32, #tpu.memory_space<vmem>>, %arg15: memref<64x32xbf16, #tpu.memory_space<vmem>>, %arg16: memref<1x32xf32, #tpu.memory_space<vmem>>, %arg17: memref<1x32xf32, #tpu.memory_space<vmem>>, %arg18: memref<1x32xf32, #tpu.memory_space<vmem>>, %arg19: memref<16x32xf32, #tpu.memory_space<vmem>>) attributes {dimension_semantics = [#tpu.dimension_semantics<parallel>], iteration_bounds = array<i64: 2>, scalar_prefetch = 0 : i64, scratch_operands = 0 : i64, tpu.core_type = #tpu.core_type<tc>, window_params = [{transform_indices = @transform_0, window_bounds = array<i64: 16, 16>}, {transform_indices = @transform_1, window_bounds = array<i64: 1, 1, 16>}, {pipeline_mode = #tpu.pipeline_mode<synchronous>, transform_indices = @transform_2, window_bounds = array<i64: 1, 16>}, {pipeline_mode = #tpu.pipeline_mode<synchronous>, transform_indices = @transform_3, window_bounds = array<i64: 1, 16>}, {pipeline_mode = #tpu.pipeline_mode<synchronous>, transform_indices = @transform_4, window_bounds = array<i64: 16, 32>}, {pipeline_mode = #tpu.pipeline_mode<synchronous>, transform_indices = @transform_5, window_bounds = array<i64: 1, 32>}, {pipeline_mode = #tpu.pipeline_mode<synchronous>, transform_indices = @transform_6, window_bounds = array<i64: 32, 96>}, {pipeline_mode = #tpu.pipeline_mode<synchronous>, transform_indices = @transform_7, window_bounds = array<i64: 1, 96>}, {pipeline_mode = #tpu.pipeline_mode<synchronous>, transform_indices = @transform_8, window_bounds = array<i64: 4, 8, 32>}, {pipeline_mode = #tpu.pipeline_mode<synchronous>, transform_indices = @transform_9, window_bounds = array<i64: 1, 32>}, {pipeline_mode = #tpu.pipeline_mode<synchronous>, transform_indices = @transform_10, window_bounds = array<i64: 1, 32>}, {pipeline_mode = #tpu.pipeline_mode<synchronous>, transform_indices = @transform_11, window_bounds = array<i64: 1, 32>}, {pipeline_mode = #tpu.pipeline_mode<synchronous>, transform_indices = @transform_12, window_bounds = array<i64: 32, 64>}, {pipeline_mode = #tpu.pipeline_mode<synchronous>, transform_indices = @transform_13, window_bounds = array<i64: 1, 64>}, {pipeline_mode = #tpu.pipeline_mode<synchronous>, transform_indices = @transform_14, window_bounds = array<i64: 64, 32>}, {pipeline_mode = #tpu.pipeline_mode<synchronous>, transform_indices = @transform_15, window_bounds = array<i64: 1, 32>}, {pipeline_mode = #tpu.pipeline_mode<synchronous>, transform_indices = @transform_16, window_bounds = array<i64: 1, 32>}, {pipeline_mode = #tpu.pipeline_mode<synchronous>, transform_indices = @transform_17, window_bounds = array<i64: 1, 32>}, {transform_indices = @transform_18, window_bounds = array<i64: 16, 32>}]} {
    %c0 = arith.constant 0 : index
    %c0_0 = arith.constant 0 : index
    %0 = vector.load %arg3[%c0, %c0_0] : memref<1x16xf32, #tpu.memory_space<vmem>>, vector<1x16xf32>
    %c0_1 = arith.constant 0 : index
    %c0_2 = arith.constant 0 : index
    %1 = vector.load %arg4[%c0_1, %c0_2] : memref<1x16xf32, #tpu.memory_space<vmem>>, vector<1x16xf32>
    %c0_3 = arith.constant 0 : index
    %c0_4 = arith.constant 0 : index
    %2 = vector.load %arg5[%c0_3, %c0_4] : memref<16x32xbf16, #tpu.memory_space<vmem>>, vector<16x32xbf16>
    %c0_5 = arith.constant 0 : index
    %c0_6 = arith.constant 0 : index
    %3 = vector.load %arg6[%c0_5, %c0_6] : memref<1x32xf32, #tpu.memory_space<vmem>>, vector<1x32xf32>
    %c0_7 = arith.constant 0 : index
    %c0_8 = arith.constant 0 : index
    %4 = vector.load %arg7[%c0_7, %c0_8] : memref<32x96xbf16, #tpu.memory_space<vmem>>, vector<32x96xbf16>
    %c0_9 = arith.constant 0 : index
    %c0_10 = arith.constant 0 : index
    %5 = vector.load %arg8[%c0_9, %c0_10] : memref<1x96xf32, #tpu.memory_space<vmem>>, vector<1x96xf32>
    %c0_11 = arith.constant 0 : index
    %c0_12 = arith.constant 0 : index
    %c0_13 = arith.constant 0 : index
    %6 = vector.load %arg9[%c0_11, %c0_12, %c0_13] : memref<4x8x32xbf16, #tpu.memory_space<vmem>>, vector<4x8x32xbf16>
    %c0_14 = arith.constant 0 : index
    %c0_15 = arith.constant 0 : index
    %7 = vector.load %arg10[%c0_14, %c0_15] : memref<1x32xf32, #tpu.memory_space<vmem>>, vector<1x32xf32>
    %c0_16 = arith.constant 0 : index
    %c0_17 = arith.constant 0 : index
    %8 = vector.load %arg11[%c0_16, %c0_17] : memref<1x32xf32, #tpu.memory_space<vmem>>, vector<1x32xf32>
    %c0_18 = arith.constant 0 : index
    %c0_19 = arith.constant 0 : index
    %9 = vector.load %arg12[%c0_18, %c0_19] : memref<1x32xf32, #tpu.memory_space<vmem>>, vector<1x32xf32>
    %c0_20 = arith.constant 0 : index
    %c0_21 = arith.constant 0 : index
    %10 = vector.load %arg13[%c0_20, %c0_21] : memref<32x64xbf16, #tpu.memory_space<vmem>>, vector<32x64xbf16>
    %c0_22 = arith.constant 0 : index
    %c0_23 = arith.constant 0 : index
    %11 = vector.load %arg14[%c0_22, %c0_23] : memref<1x64xf32, #tpu.memory_space<vmem>>, vector<1x64xf32>
    %c0_24 = arith.constant 0 : index
    %c0_25 = arith.constant 0 : index
    %12 = vector.load %arg15[%c0_24, %c0_25] : memref<64x32xbf16, #tpu.memory_space<vmem>>, vector<64x32xbf16>
    %c0_26 = arith.constant 0 : index
    %c0_27 = arith.constant 0 : index
    %13 = vector.load %arg16[%c0_26, %c0_27] : memref<1x32xf32, #tpu.memory_space<vmem>>, vector<1x32xf32>
    %c0_28 = arith.constant 0 : index
    %c0_29 = arith.constant 0 : index
    %14 = vector.load %arg17[%c0_28, %c0_29] : memref<1x32xf32, #tpu.memory_space<vmem>>, vector<1x32xf32>
    %c0_30 = arith.constant 0 : index
    %c0_31 = arith.constant 0 : index
    %15 = vector.load %arg18[%c0_30, %c0_31] : memref<1x32xf32, #tpu.memory_space<vmem>>, vector<1x32xf32>
    %c0_32 = arith.constant 0 : index
    %c0_33 = arith.constant 0 : index
    %c0_34 = arith.constant 0 : index
    %16 = vector.load %arg2[%c0_32, %c0_33, %c0_34] : memref<1x1x16xf32, #tpu.memory_space<vmem>>, vector<1x1x16xf32>
    %17 = vector.shape_cast %16 : vector<1x1x16xf32> to vector<1x1x16xf32>
    %18 = vector.broadcast %17 : vector<1x1x16xf32> to vector<1x16x16xf32>
    %c0_35 = arith.constant 0 : index
    %c0_36 = arith.constant 0 : index
    %19 = vector.load %arg1[%c0_35, %c0_36] : memref<16x16xf32, #tpu.memory_space<vmem>>, vector<16x16xf32>
    %cst = arith.constant dense<0.000000e+00> : vector<16xf32>
    %20 = vector.multi_reduction <add>, %19, %cst [1] : vector<16x16xf32> to vector<16xf32>
    %21 = vector.shape_cast %20 : vector<16xf32> to vector<16x1xf32>
    %cst_37 = arith.constant 1.600000e+01 : f32
    %22 = vector.broadcast %cst_37 : f32 to vector<16x1xf32>
    %23 = arith.divf %21, %22 : vector<16x1xf32>
    %24 = vector.broadcast %23 : vector<16x1xf32> to vector<16x16xf32>
    %25 = arith.subf %19, %24 : vector<16x16xf32>
    %26 = arith.mulf %25, %25 : vector<16x16xf32>
    %cst_38 = arith.constant dense<0.000000e+00> : vector<16xf32>
    %27 = vector.multi_reduction <add>, %26, %cst_38 [1] : vector<16x16xf32> to vector<16xf32>
    %28 = vector.shape_cast %27 : vector<16xf32> to vector<16x1xf32>
    %cst_39 = arith.constant 1.600000e+01 : f32
    %29 = vector.broadcast %cst_39 : f32 to vector<16x1xf32>
    %30 = arith.divf %28, %29 : vector<16x1xf32>
    %31 = vector.broadcast %23 : vector<16x1xf32> to vector<16x16xf32>
    %32 = arith.subf %19, %31 : vector<16x16xf32>
    %cst_40 = arith.constant 9.99999996E-13 : f32
    %33 = vector.broadcast %cst_40 : f32 to vector<16x1xf32>
    %34 = arith.addf %30, %33 : vector<16x1xf32>
    %35 = math.rsqrt %34 : vector<16x1xf32>
    %36 = vector.broadcast %35 : vector<16x1xf32> to vector<16x16xf32>
    %37 = arith.mulf %32, %36 : vector<16x16xf32>
    %38 = vector.broadcast %0 : vector<1x16xf32> to vector<16x16xf32>
    %39 = arith.mulf %37, %38 : vector<16x16xf32>
    %40 = vector.broadcast %1 : vector<1x16xf32> to vector<16x16xf32>
    %41 = arith.addf %39, %40 : vector<16x16xf32>
    %42 = arith.truncf %41 : vector<16x16xf32> to vector<16x16xbf16>
    %cst_41 = arith.constant dense<0.000000e+00> : vector<16x32xf32>
    %43 = tpu.matmul %42, %2, %cst_41 {dimension_numbers = #tpu.dot_dimension_numbers<[1], [0], [0], [1], [0, 0, 1, 1], [], []>} : vector<16x16xbf16>, vector<16x32xbf16>, vector<16x32xf32> -> vector<16x32xf32>
    %44 = vector.broadcast %3 : vector<1x32xf32> to vector<16x32xf32>
    %45 = arith.addf %43, %44 : vector<16x32xf32>
    %c0_i32 = arith.constant 0 : i32
    %c2_i32 = arith.constant 2 : i32
    %46 = arith.addi %c0_i32, %c2_i32 : i32
    %c1_i32 = arith.constant 1 : i32
    %47 = scf.for %arg20 = %c0_i32 to %46 step %c1_i32 iter_args(%arg21 = %45) -> (vector<16x32xf32>)  : i32 {
      %49 = arith.truncf %arg21 : vector<16x32xf32> to vector<16x32xbf16>
      %cst_44 = arith.constant dense<0.000000e+00> : vector<16x96xf32>
      %50 = tpu.matmul %49, %4, %cst_44 {dimension_numbers = #tpu.dot_dimension_numbers<[1], [0], [0], [1], [0, 0, 1, 1], [], []>} : vector<16x32xbf16>, vector<32x96xbf16>, vector<16x96xf32> -> vector<16x96xf32>
      %51 = vector.broadcast %5 : vector<1x96xf32> to vector<16x96xf32>
      %52 = arith.addf %50, %51 : vector<16x96xf32>
      %53 = vector.extract_strided_slice %52 {offsets = [0, 0], sizes = [16, 8], strides = [1, 1]} : vector<16x96xf32> to vector<16x8xf32>
      %cst_45 = arith.constant 0.353553385 : f32
      %54 = vector.broadcast %cst_45 : f32 to vector<16x8xf32>
      %55 = arith.mulf %53, %54 : vector<16x8xf32>
      %56 = vector.shape_cast %55 : vector<16x8xf32> to vector<1x16x8xf32>
      %57 = arith.truncf %56 : vector<1x16x8xf32> to vector<1x16x8xbf16>
      %58 = vector.extract_strided_slice %52 {offsets = [0, 32], sizes = [16, 8], strides = [1, 1]} : vector<16x96xf32> to vector<16x8xf32>
      %59 = vector.shape_cast %58 : vector<16x8xf32> to vector<1x16x8xf32>
      %60 = arith.truncf %59 : vector<1x16x8xf32> to vector<1x16x8xbf16>
      %61 = vector.extract_strided_slice %52 {offsets = [0, 64], sizes = [16, 8], strides = [1, 1]} : vector<16x96xf32> to vector<16x8xf32>
      %62 = vector.shape_cast %61 : vector<16x8xf32> to vector<1x16x8xf32>
      %63 = arith.truncf %62 : vector<1x16x8xf32> to vector<1x16x8xbf16>
      "tpu.trace_start"() <{level = 10 : i32, message = "bqd,bkd->bqk"}> : () -> ()
      %cst_46 = arith.constant dense<0.000000e+00> : vector<1x16x16xf32>
      %64 = tpu.matmul %57, %60, %cst_46 {dimension_numbers = #tpu.dot_dimension_numbers<[2], [2], [1], [1], [0, 0, 0, 1, 1, 1], [0], [0]>} : vector<1x16x8xbf16>, vector<1x16x8xbf16>, vector<1x16x16xf32> -> vector<1x16x16xf32>
      "tpu.trace_stop"() : () -> ()
      %65 = arith.addf %64, %18 : vector<1x16x16xf32>
      %cst_47 = arith.constant dense<0xFF800000> : vector<1x16xf32>
      %66 = vector.multi_reduction <maximumf>, %65, %cst_47 [2] : vector<1x16x16xf32> to vector<1x16xf32>
      %67 = vector.shape_cast %66 : vector<1x16xf32> to vector<1x16x1xf32>
      %68 = vector.broadcast %67 : vector<1x16x1xf32> to vector<1x16x16xf32>
      %69 = arith.subf %65, %68 : vector<1x16x16xf32>
      %70 = math.exp %69 : vector<1x16x16xf32>
      %cst_48 = arith.constant dense<0.000000e+00> : vector<1x16xf32>
      %71 = vector.multi_reduction <add>, %70, %cst_48 [2] : vector<1x16x16xf32> to vector<1x16xf32>
      %72 = vector.shape_cast %71 : vector<1x16xf32> to vector<1x16x1xf32>
      %73 = arith.truncf %70 : vector<1x16x16xf32> to vector<1x16x16xbf16>
      "tpu.trace_start"() <{level = 10 : i32, message = "bqk,bkd->bqd"}> : () -> ()
      %cst_49 = arith.constant dense<0.000000e+00> : vector<1x16x8xf32>
      %74 = tpu.matmul %73, %63, %cst_49 {dimension_numbers = #tpu.dot_dimension_numbers<[2], [1], [1], [2], [0, 0, 0, 1, 1, 2], [0], [0]>} : vector<1x16x16xbf16>, vector<1x16x8xbf16>, vector<1x16x8xf32> -> vector<1x16x8xf32>
      "tpu.trace_stop"() : () -> ()
      %75 = vector.broadcast %72 : vector<1x16x1xf32> to vector<1x16x8xf32>
      %76 = arith.divf %74, %75 : vector<1x16x8xf32>
      %77 = vector.shape_cast %76 : vector<1x16x8xf32> to vector<16x8xf32>
      %78 = arith.truncf %77 : vector<16x8xf32> to vector<16x8xbf16>
      %79 = vector.extract_strided_slice %6 {offsets = [0, 0, 0], sizes = [1, 8, 32], strides = [1, 1, 1]} : vector<4x8x32xbf16> to vector<1x8x32xbf16>
      %80 = vector.shape_cast %79 : vector<1x8x32xbf16> to vector<8x32xbf16>
      %cst_50 = arith.constant dense<0.000000e+00> : vector<16x32xf32>
      %81 = tpu.matmul %78, %80, %cst_50 {dimension_numbers = #tpu.dot_dimension_numbers<[1], [0], [0], [1], [0, 0, 1, 1], [], []>} : vector<16x8xbf16>, vector<8x32xbf16>, vector<16x32xf32> -> vector<16x32xf32>
      %82 = vector.extract_strided_slice %52 {offsets = [0, 8], sizes = [16, 8], strides = [1, 1]} : vector<16x96xf32> to vector<16x8xf32>
      %cst_51 = arith.constant 0.353553385 : f32
      %83 = vector.broadcast %cst_51 : f32 to vector<16x8xf32>
      %84 = arith.mulf %82, %83 : vector<16x8xf32>
      %85 = vector.shape_cast %84 : vector<16x8xf32> to vector<1x16x8xf32>
      %86 = arith.truncf %85 : vector<1x16x8xf32> to vector<1x16x8xbf16>
      %87 = vector.extract_strided_slice %52 {offsets = [0, 40], sizes = [16, 8], strides = [1, 1]} : vector<16x96xf32> to vector<16x8xf32>
      %88 = vector.shape_cast %87 : vector<16x8xf32> to vector<1x16x8xf32>
      %89 = arith.truncf %88 : vector<1x16x8xf32> to vector<1x16x8xbf16>
      %90 = vector.extract_strided_slice %52 {offsets = [0, 72], sizes = [16, 8], strides = [1, 1]} : vector<16x96xf32> to vector<16x8xf32>
      %91 = vector.shape_cast %90 : vector<16x8xf32> to vector<1x16x8xf32>
      %92 = arith.truncf %91 : vector<1x16x8xf32> to vector<1x16x8xbf16>
      "tpu.trace_start"() <{level = 10 : i32, message = "bqd,bkd->bqk"}> : () -> ()
      %cst_52 = arith.constant dense<0.000000e+00> : vector<1x16x16xf32>
      %93 = tpu.matmul %86, %89, %cst_52 {dimension_numbers = #tpu.dot_dimension_numbers<[2], [2], [1], [1], [0, 0, 0, 1, 1, 1], [0], [0]>} : vector<1x16x8xbf16>, vector<1x16x8xbf16>, vector<1x16x16xf32> -> vector<1x16x16xf32>
      "tpu.trace_stop"() : () -> ()
      %94 = arith.addf %93, %18 : vector<1x16x16xf32>
      %cst_53 = arith.constant dense<0xFF800000> : vector<1x16xf32>
      %95 = vector.multi_reduction <maximumf>, %94, %cst_53 [2] : vector<1x16x16xf32> to vector<1x16xf32>
      %96 = vector.shape_cast %95 : vector<1x16xf32> to vector<1x16x1xf32>
      %97 = vector.broadcast %96 : vector<1x16x1xf32> to vector<1x16x16xf32>
      %98 = arith.subf %94, %97 : vector<1x16x16xf32>
      %99 = math.exp %98 : vector<1x16x16xf32>
      %cst_54 = arith.constant dense<0.000000e+00> : vector<1x16xf32>
      %100 = vector.multi_reduction <add>, %99, %cst_54 [2] : vector<1x16x16xf32> to vector<1x16xf32>
      %101 = vector.shape_cast %100 : vector<1x16xf32> to vector<1x16x1xf32>
      %102 = arith.truncf %99 : vector<1x16x16xf32> to vector<1x16x16xbf16>
      "tpu.trace_start"() <{level = 10 : i32, message = "bqk,bkd->bqd"}> : () -> ()
      %cst_55 = arith.constant dense<0.000000e+00> : vector<1x16x8xf32>
      %103 = tpu.matmul %102, %92, %cst_55 {dimension_numbers = #tpu.dot_dimension_numbers<[2], [1], [1], [2], [0, 0, 0, 1, 1, 2], [0], [0]>} : vector<1x16x16xbf16>, vector<1x16x8xbf16>, vector<1x16x8xf32> -> vector<1x16x8xf32>
      "tpu.trace_stop"() : () -> ()
      %104 = vector.broadcast %101 : vector<1x16x1xf32> to vector<1x16x8xf32>
      %105 = arith.divf %103, %104 : vector<1x16x8xf32>
      %106 = vector.shape_cast %105 : vector<1x16x8xf32> to vector<16x8xf32>
      %107 = arith.truncf %106 : vector<16x8xf32> to vector<16x8xbf16>
      %108 = vector.extract_strided_slice %6 {offsets = [1, 0, 0], sizes = [1, 8, 32], strides = [1, 1, 1]} : vector<4x8x32xbf16> to vector<1x8x32xbf16>
      %109 = vector.shape_cast %108 : vector<1x8x32xbf16> to vector<8x32xbf16>
      %cst_56 = arith.constant dense<0.000000e+00> : vector<16x32xf32>
      %110 = tpu.matmul %107, %109, %cst_56 {dimension_numbers = #tpu.dot_dimension_numbers<[1], [0], [0], [1], [0, 0, 1, 1], [], []>} : vector<16x8xbf16>, vector<8x32xbf16>, vector<16x32xf32> -> vector<16x32xf32>
      %111 = arith.addf %81, %110 : vector<16x32xf32>
      %112 = vector.extract_strided_slice %52 {offsets = [0, 16], sizes = [16, 8], strides = [1, 1]} : vector<16x96xf32> to vector<16x8xf32>
      %cst_57 = arith.constant 0.353553385 : f32
      %113 = vector.broadcast %cst_57 : f32 to vector<16x8xf32>
      %114 = arith.mulf %112, %113 : vector<16x8xf32>
      %115 = vector.shape_cast %114 : vector<16x8xf32> to vector<1x16x8xf32>
      %116 = arith.truncf %115 : vector<1x16x8xf32> to vector<1x16x8xbf16>
      %117 = vector.extract_strided_slice %52 {offsets = [0, 48], sizes = [16, 8], strides = [1, 1]} : vector<16x96xf32> to vector<16x8xf32>
      %118 = vector.shape_cast %117 : vector<16x8xf32> to vector<1x16x8xf32>
      %119 = arith.truncf %118 : vector<1x16x8xf32> to vector<1x16x8xbf16>
      %120 = vector.extract_strided_slice %52 {offsets = [0, 80], sizes = [16, 8], strides = [1, 1]} : vector<16x96xf32> to vector<16x8xf32>
      %121 = vector.shape_cast %120 : vector<16x8xf32> to vector<1x16x8xf32>
      %122 = arith.truncf %121 : vector<1x16x8xf32> to vector<1x16x8xbf16>
      "tpu.trace_start"() <{level = 10 : i32, message = "bqd,bkd->bqk"}> : () -> ()
      %cst_58 = arith.constant dense<0.000000e+00> : vector<1x16x16xf32>
      %123 = tpu.matmul %116, %119, %cst_58 {dimension_numbers = #tpu.dot_dimension_numbers<[2], [2], [1], [1], [0, 0, 0, 1, 1, 1], [0], [0]>} : vector<1x16x8xbf16>, vector<1x16x8xbf16>, vector<1x16x16xf32> -> vector<1x16x16xf32>
      "tpu.trace_stop"() : () -> ()
      %124 = arith.addf %123, %18 : vector<1x16x16xf32>
      %cst_59 = arith.constant dense<0xFF800000> : vector<1x16xf32>
      %125 = vector.multi_reduction <maximumf>, %124, %cst_59 [2] : vector<1x16x16xf32> to vector<1x16xf32>
      %126 = vector.shape_cast %125 : vector<1x16xf32> to vector<1x16x1xf32>
      %127 = vector.broadcast %126 : vector<1x16x1xf32> to vector<1x16x16xf32>
      %128 = arith.subf %124, %127 : vector<1x16x16xf32>
      %129 = math.exp %128 : vector<1x16x16xf32>
      %cst_60 = arith.constant dense<0.000000e+00> : vector<1x16xf32>
      %130 = vector.multi_reduction <add>, %129, %cst_60 [2] : vector<1x16x16xf32> to vector<1x16xf32>
      %131 = vector.shape_cast %130 : vector<1x16xf32> to vector<1x16x1xf32>
      %132 = arith.truncf %129 : vector<1x16x16xf32> to vector<1x16x16xbf16>
      "tpu.trace_start"() <{level = 10 : i32, message = "bqk,bkd->bqd"}> : () -> ()
      %cst_61 = arith.constant dense<0.000000e+00> : vector<1x16x8xf32>
      %133 = tpu.matmul %132, %122, %cst_61 {dimension_numbers = #tpu.dot_dimension_numbers<[2], [1], [1], [2], [0, 0, 0, 1, 1, 2], [0], [0]>} : vector<1x16x16xbf16>, vector<1x16x8xbf16>, vector<1x16x8xf32> -> vector<1x16x8xf32>
      "tpu.trace_stop"() : () -> ()
      %134 = vector.broadcast %131 : vector<1x16x1xf32> to vector<1x16x8xf32>
      %135 = arith.divf %133, %134 : vector<1x16x8xf32>
      %136 = vector.shape_cast %135 : vector<1x16x8xf32> to vector<16x8xf32>
      %137 = arith.truncf %136 : vector<16x8xf32> to vector<16x8xbf16>
      %138 = vector.extract_strided_slice %6 {offsets = [2, 0, 0], sizes = [1, 8, 32], strides = [1, 1, 1]} : vector<4x8x32xbf16> to vector<1x8x32xbf16>
      %139 = vector.shape_cast %138 : vector<1x8x32xbf16> to vector<8x32xbf16>
      %cst_62 = arith.constant dense<0.000000e+00> : vector<16x32xf32>
      %140 = tpu.matmul %137, %139, %cst_62 {dimension_numbers = #tpu.dot_dimension_numbers<[1], [0], [0], [1], [0, 0, 1, 1], [], []>} : vector<16x8xbf16>, vector<8x32xbf16>, vector<16x32xf32> -> vector<16x32xf32>
      %141 = arith.addf %111, %140 : vector<16x32xf32>
      %142 = vector.extract_strided_slice %52 {offsets = [0, 24], sizes = [16, 8], strides = [1, 1]} : vector<16x96xf32> to vector<16x8xf32>
      %cst_63 = arith.constant 0.353553385 : f32
      %143 = vector.broadcast %cst_63 : f32 to vector<16x8xf32>
      %144 = arith.mulf %142, %143 : vector<16x8xf32>
      %145 = vector.shape_cast %144 : vector<16x8xf32> to vector<1x16x8xf32>
      %146 = arith.truncf %145 : vector<1x16x8xf32> to vector<1x16x8xbf16>
      %147 = vector.extract_strided_slice %52 {offsets = [0, 56], sizes = [16, 8], strides = [1, 1]} : vector<16x96xf32> to vector<16x8xf32>
      %148 = vector.shape_cast %147 : vector<16x8xf32> to vector<1x16x8xf32>
      %149 = arith.truncf %148 : vector<1x16x8xf32> to vector<1x16x8xbf16>
      %150 = vector.extract_strided_slice %52 {offsets = [0, 88], sizes = [16, 8], strides = [1, 1]} : vector<16x96xf32> to vector<16x8xf32>
      %151 = vector.shape_cast %150 : vector<16x8xf32> to vector<1x16x8xf32>
      %152 = arith.truncf %151 : vector<1x16x8xf32> to vector<1x16x8xbf16>
      "tpu.trace_start"() <{level = 10 : i32, message = "bqd,bkd->bqk"}> : () -> ()
      %cst_64 = arith.constant dense<0.000000e+00> : vector<1x16x16xf32>
      %153 = tpu.matmul %146, %149, %cst_64 {dimension_numbers = #tpu.dot_dimension_numbers<[2], [2], [1], [1], [0, 0, 0, 1, 1, 1], [0], [0]>} : vector<1x16x8xbf16>, vector<1x16x8xbf16>, vector<1x16x16xf32> -> vector<1x16x16xf32>
      "tpu.trace_stop"() : () -> ()
      %154 = arith.addf %153, %18 : vector<1x16x16xf32>
      %cst_65 = arith.constant dense<0xFF800000> : vector<1x16xf32>
      %155 = vector.multi_reduction <maximumf>, %154, %cst_65 [2] : vector<1x16x16xf32> to vector<1x16xf32>
      %156 = vector.shape_cast %155 : vector<1x16xf32> to vector<1x16x1xf32>
      %157 = vector.broadcast %156 : vector<1x16x1xf32> to vector<1x16x16xf32>
      %158 = arith.subf %154, %157 : vector<1x16x16xf32>
      %159 = math.exp %158 : vector<1x16x16xf32>
      %cst_66 = arith.constant dense<0.000000e+00> : vector<1x16xf32>
      %160 = vector.multi_reduction <add>, %159, %cst_66 [2] : vector<1x16x16xf32> to vector<1x16xf32>
      %161 = vector.shape_cast %160 : vector<1x16xf32> to vector<1x16x1xf32>
      %162 = arith.truncf %159 : vector<1x16x16xf32> to vector<1x16x16xbf16>
      "tpu.trace_start"() <{level = 10 : i32, message = "bqk,bkd->bqd"}> : () -> ()
      %cst_67 = arith.constant dense<0.000000e+00> : vector<1x16x8xf32>
      %163 = tpu.matmul %162, %152, %cst_67 {dimension_numbers = #tpu.dot_dimension_numbers<[2], [1], [1], [2], [0, 0, 0, 1, 1, 2], [0], [0]>} : vector<1x16x16xbf16>, vector<1x16x8xbf16>, vector<1x16x8xf32> -> vector<1x16x8xf32>
      "tpu.trace_stop"() : () -> ()
      %164 = vector.broadcast %161 : vector<1x16x1xf32> to vector<1x16x8xf32>
      %165 = arith.divf %163, %164 : vector<1x16x8xf32>
      %166 = vector.shape_cast %165 : vector<1x16x8xf32> to vector<16x8xf32>
      %167 = arith.truncf %166 : vector<16x8xf32> to vector<16x8xbf16>
      %168 = vector.extract_strided_slice %6 {offsets = [3, 0, 0], sizes = [1, 8, 32], strides = [1, 1, 1]} : vector<4x8x32xbf16> to vector<1x8x32xbf16>
      %169 = vector.shape_cast %168 : vector<1x8x32xbf16> to vector<8x32xbf16>
      %cst_68 = arith.constant dense<0.000000e+00> : vector<16x32xf32>
      %170 = tpu.matmul %167, %169, %cst_68 {dimension_numbers = #tpu.dot_dimension_numbers<[1], [0], [0], [1], [0, 0, 1, 1], [], []>} : vector<16x8xbf16>, vector<8x32xbf16>, vector<16x32xf32> -> vector<16x32xf32>
      %171 = arith.addf %141, %170 : vector<16x32xf32>
      %172 = vector.broadcast %7 : vector<1x32xf32> to vector<16x32xf32>
      %173 = arith.addf %171, %172 : vector<16x32xf32>
      %174 = arith.addf %173, %arg21 : vector<16x32xf32>
      %cst_69 = arith.constant dense<0.000000e+00> : vector<16xf32>
      %175 = vector.multi_reduction <add>, %174, %cst_69 [1] : vector<16x32xf32> to vector<16xf32>
      %176 = vector.shape_cast %175 : vector<16xf32> to vector<16x1xf32>
      %cst_70 = arith.constant 3.200000e+01 : f32
      %177 = vector.broadcast %cst_70 : f32 to vector<16x1xf32>
      %178 = arith.divf %176, %177 : vector<16x1xf32>
      %179 = vector.broadcast %178 : vector<16x1xf32> to vector<16x32xf32>
      %180 = arith.subf %174, %179 : vector<16x32xf32>
      %181 = arith.mulf %180, %180 : vector<16x32xf32>
      %cst_71 = arith.constant dense<0.000000e+00> : vector<16xf32>
      %182 = vector.multi_reduction <add>, %181, %cst_71 [1] : vector<16x32xf32> to vector<16xf32>
      %183 = vector.shape_cast %182 : vector<16xf32> to vector<16x1xf32>
      %cst_72 = arith.constant 3.200000e+01 : f32
      %184 = vector.broadcast %cst_72 : f32 to vector<16x1xf32>
      %185 = arith.divf %183, %184 : vector<16x1xf32>
      %186 = vector.broadcast %178 : vector<16x1xf32> to vector<16x32xf32>
      %187 = arith.subf %174, %186 : vector<16x32xf32>
      %cst_73 = arith.constant 9.99999996E-13 : f32
      %188 = vector.broadcast %cst_73 : f32 to vector<16x1xf32>
      %189 = arith.addf %185, %188 : vector<16x1xf32>
      %190 = math.rsqrt %189 : vector<16x1xf32>
      %191 = vector.broadcast %190 : vector<16x1xf32> to vector<16x32xf32>
      %192 = arith.mulf %187, %191 : vector<16x32xf32>
      %193 = vector.broadcast %8 : vector<1x32xf32> to vector<16x32xf32>
      %194 = arith.mulf %192, %193 : vector<16x32xf32>
      %195 = vector.broadcast %9 : vector<1x32xf32> to vector<16x32xf32>
      %196 = arith.addf %194, %195 : vector<16x32xf32>
      %197 = arith.truncf %196 : vector<16x32xf32> to vector<16x32xbf16>
      %cst_74 = arith.constant dense<0.000000e+00> : vector<16x64xf32>
      %198 = tpu.matmul %197, %10, %cst_74 {dimension_numbers = #tpu.dot_dimension_numbers<[1], [0], [0], [1], [0, 0, 1, 1], [], []>} : vector<16x32xbf16>, vector<32x64xbf16>, vector<16x64xf32> -> vector<16x64xf32>
      %199 = vector.broadcast %11 : vector<1x64xf32> to vector<16x64xf32>
      %200 = arith.addf %198, %199 : vector<16x64xf32>
      %201 = arith.mulf %200, %200 : vector<16x64xf32>
      %202 = arith.mulf %200, %201 : vector<16x64xf32>
      %cst_75 = arith.constant 4.471500e-02 : f32
      %203 = vector.broadcast %cst_75 : f32 to vector<16x64xf32>
      %204 = arith.mulf %203, %202 : vector<16x64xf32>
      %205 = arith.addf %200, %204 : vector<16x64xf32>
      %cst_76 = arith.constant 0.797884583 : f32
      %206 = vector.broadcast %cst_76 : f32 to vector<16x64xf32>
      %207 = arith.mulf %206, %205 : vector<16x64xf32>
      %208 = math.tanh %207 : vector<16x64xf32>
      %cst_77 = arith.constant 1.000000e+00 : f32
      %209 = vector.broadcast %cst_77 : f32 to vector<16x64xf32>
      %210 = arith.addf %209, %208 : vector<16x64xf32>
      %cst_78 = arith.constant 5.000000e-01 : f32
      %211 = vector.broadcast %cst_78 : f32 to vector<16x64xf32>
      %212 = arith.mulf %211, %210 : vector<16x64xf32>
      %213 = arith.mulf %200, %212 : vector<16x64xf32>
      %214 = arith.truncf %213 : vector<16x64xf32> to vector<16x64xbf16>
      %cst_79 = arith.constant dense<0.000000e+00> : vector<16x32xf32>
      %215 = tpu.matmul %214, %12, %cst_79 {dimension_numbers = #tpu.dot_dimension_numbers<[1], [0], [0], [1], [0, 0, 1, 1], [], []>} : vector<16x64xbf16>, vector<64x32xbf16>, vector<16x32xf32> -> vector<16x32xf32>
      %216 = vector.broadcast %13 : vector<1x32xf32> to vector<16x32xf32>
      %217 = arith.addf %215, %216 : vector<16x32xf32>
      %218 = arith.addf %217, %196 : vector<16x32xf32>
      %cst_80 = arith.constant dense<0.000000e+00> : vector<16xf32>
      %219 = vector.multi_reduction <add>, %218, %cst_80 [1] : vector<16x32xf32> to vector<16xf32>
      %220 = vector.shape_cast %219 : vector<16xf32> to vector<16x1xf32>
      %cst_81 = arith.constant 3.200000e+01 : f32
      %221 = vector.broadcast %cst_81 : f32 to vector<16x1xf32>
      %222 = arith.divf %220, %221 : vector<16x1xf32>
      %223 = vector.broadcast %222 : vector<16x1xf32> to vector<16x32xf32>
      %224 = arith.subf %218, %223 : vector<16x32xf32>
      %225 = arith.mulf %224, %224 : vector<16x32xf32>
      %cst_82 = arith.constant dense<0.000000e+00> : vector<16xf32>
      %226 = vector.multi_reduction <add>, %225, %cst_82 [1] : vector<16x32xf32> to vector<16xf32>
      %227 = vector.shape_cast %226 : vector<16xf32> to vector<16x1xf32>
      %cst_83 = arith.constant 3.200000e+01 : f32
      %228 = vector.broadcast %cst_83 : f32 to vector<16x1xf32>
      %229 = arith.divf %227, %228 : vector<16x1xf32>
      %230 = vector.broadcast %222 : vector<16x1xf32> to vector<16x32xf32>
      %231 = arith.subf %218, %230 : vector<16x32xf32>
      %cst_84 = arith.constant 9.99999996E-13 : f32
      %232 = vector.broadcast %cst_84 : f32 to vector<16x1xf32>
      %233 = arith.addf %229, %232 : vector<16x1xf32>
      %234 = math.rsqrt %233 : vector<16x1xf32>
      %235 = vector.broadcast %234 : vector<16x1xf32> to vector<16x32xf32>
      %236 = arith.mulf %231, %235 : vector<16x32xf32>
      %237 = vector.broadcast %14 : vector<1x32xf32> to vector<16x32xf32>
      %238 = arith.mulf %236, %237 : vector<16x32xf32>
      %239 = vector.broadcast %15 : vector<1x32xf32> to vector<16x32xf32>
      %240 = arith.addf %238, %239 : vector<16x32xf32>
      scf.yield %240 : vector<16x32xf32>
    }
    %c0_42 = arith.constant 0 : index
    %c0_43 = arith.constant 0 : index
    %48 = vector.load %arg19[%c0_42, %c0_43] : memref<16x32xf32, #tpu.memory_space<vmem>>, vector<16x32xf32>
    tpu.vector_store %arg19[%c0_42, %c0_43], %47 {strides = array<i32>} : memref<16x32xf32, #tpu.memory_space<vmem>>, vector<16x32xf32>,
    return
  }
  func.func @transform_0(%arg0: i32) -> (i32, i32) {
    %c0_i32 = arith.constant 0 : i32
    %c0_i32_0 = arith.constant 0 : i32
    return %arg0, %c0_i32 : i32, i32
  }
  func.func @transform_1(%arg0: i32) -> (i32, i32, i32) {
    %c0_i32 = arith.constant 0 : i32
    %c0_i32_0 = arith.constant 0 : i32
    %c0_i32_1 = arith.constant 0 : i32
    return %arg0, %c0_i32, %c0_i32_0 : i32, i32, i32
  }
  func.func @transform_2(%arg0: i32) -> (i32, i32) {
    %c0_i32 = arith.constant 0 : i32
    %c0_i32_0 = arith.constant 0 : i32
    %c0_i32_1 = arith.constant 0 : i32
    return %c0_i32, %c0_i32_0 : i32, i32
  }
  func.func @transform_3(%arg0: i32) -> (i32, i32) {
    %c0_i32 = arith.constant 0 : i32
    %c0_i32_0 = arith.constant 0 : i32
    %c0_i32_1 = arith.constant 0 : i32
    return %c0_i32, %c0_i32_0 : i32, i32
  }
  func.func @transform_4(%arg0: i32) -> (i32, i32) {
    %c0_i32 = arith.constant 0 : i32
    %c0_i32_0 = arith.constant 0 : i32
    %c0_i32_1 = arith.constant 0 : i32
    return %c0_i32, %c0_i32_0 : i32, i32
  }
  func.func @transform_5(%arg0: i32) -> (i32, i32) {
    %c0_i32 = arith.constant 0 : i32
    %c0_i32_0 = arith.constant 0 : i32
    %c0_i32_1 = arith.constant 0 : i32
    return %c0_i32, %c0_i32_0 : i32, i32
  }
  func.func @transform_6(%arg0: i32) -> (i32, i32) {
    %c0_i32 = arith.constant 0 : i32
    %c0_i32_0 = arith.constant 0 : i32
    %c0_i32_1 = arith.constant 0 : i32
    return %c0_i32, %c0_i32_0 : i32, i32
  }
  func.func @transform_7(%arg0: i32) -> (i32, i32) {
    %c0_i32 = arith.constant 0 : i32
    %c0_i32_0 = arith.constant 0 : i32
    %c0_i32_1 = arith.constant 0 : i32
    return %c0_i32, %c0_i32_0 : i32, i32
  }
  func.func @transform_8(%arg0: i32) -> (i32, i32, i32) {
    %c0_i32 = arith.constant 0 : i32
    %c0_i32_0 = arith.constant 0 : i32
    %c0_i32_1 = arith.constant 0 : i32
    %c0_i32_2 = arith.constant 0 : i32
    return %c0_i32, %c0_i32_0, %c0_i32_1 : i32, i32, i32
  }
  func.func @transform_9(%arg0: i32) -> (i32, i32) {
    %c0_i32 = arith.constant 0 : i32
    %c0_i32_0 = arith.constant 0 : i32
    %c0_i32_1 = arith.constant 0 : i32
    return %c0_i32, %c0_i32_0 : i32, i32
  }
  func.func @transform_10(%arg0: i32) -> (i32, i32) {
    %c0_i32 = arith.constant 0 : i32
    %c0_i32_0 = arith.constant 0 : i32
    %c0_i32_1 = arith.constant 0 : i32
    return %c0_i32, %c0_i32_0 : i32, i32
  }
  func.func @transform_11(%arg0: i32) -> (i32, i32) {
    %c0_i32 = arith.constant 0 : i32
    %c0_i32_0 = arith.constant 0 : i32
    %c0_i32_1 = arith.constant 0 : i32
    return %c0_i32, %c0_i32_0 : i32, i32
  }
  func.func @transform_12(%arg0: i32) -> (i32, i32) {
    %c0_i32 = arith.constant 0 : i32
    %c0_i32_0 = arith.constant 0 : i32
    %c0_i32_1 = arith.constant 0 : i32
    return %c0_i32, %c0_i32_0 : i32, i32
  }
  func.func @transform_13(%arg0: i32) -> (i32, i32) {
    %c0_i32 = arith.constant 0 : i32
    %c0_i32_0 = arith.constant 0 : i32
    %c0_i32_1 = arith.constant 0 : i32
    return %c0_i32, %c0_i32_0 : i32, i32
  }
  func.func @transform_14(%arg0: i32) -> (i32, i32) {
    %c0_i32 = arith.constant 0 : i32
    %c0_i32_0 = arith.constant 0 : i32
    %c0_i32_1 = arith.constant 0 : i32
    return %c0_i32, %c0_i32_0 : i32, i32
  }
  func.func @transform_15(%arg0: i32) -> (i32, i32) {
    %c0_i32 = arith.constant 0 : i32
    %c0_i32_0 = arith.constant 0 : i32
    %c0_i32_1 = arith.constant 0 : i32
    return %c0_i32, %c0_i32_0 : i32, i32
  }
  func.func @transform_16(%arg0: i32) -> (i32, i32) {
    %c0_i32 = arith.constant 0 : i32
    %c0_i32_0 = arith.constant 0 : i32
    %c0_i32_1 = arith.constant 0 : i32
    return %c0_i32, %c0_i32_0 : i32, i32
  }
  func.func @transform_17(%arg0: i32) -> (i32, i32) {
    %c0_i32 = arith.constant 0 : i32
    %c0_i32_0 = arith.constant 0 : i32
    %c0_i32_1 = arith.constant 0 : i32
    return %c0_i32, %c0_i32_0 : i32, i32
  }
  func.func @transform_18(%arg0: i32) -> (i32, i32) {
    %c0_i32 = arith.constant 0 : i32
    %c0_i32_0 = arith.constant 0 : i32
    return %arg0, %c0_i32 : i32, i32
  }
}

</mosaic_0001>

<bundles_post_ra>
// kernel: tpu_custom_call.1
= control target key start
LH: loop header
LB: loop body
LE: loop exit
PB: predicated region body
PF: predicated region fallthrough
CT: control target
= control target key end

     0   :  { %s2837_s0 = inlined_call_operand.vmem [shape: f32[32,16], index: 0, kind: input, shape index: {}]   ;;  %s2838_s1 = inlined_call_operand.vmem [shape: f32[2,1,16], index: 1, kind: input, shape index: {}]   ;;  %s2839_s2 = inlined_call_operand.vmem [shape: f32[1,16], index: 2, kind: input, shape index: {}]   ;;  %s2840_s3 = inlined_call_operand.vmem [shape: f32[1,16], index: 3, kind: input, shape index: {}]   ;;  %s2841_s4 = inlined_call_operand.vmem [shape: bf16[16,32], index: 4, kind: input, shape index: {}]   ;;  %s2842_s5 = inlined_call_operand.vmem [shape: f32[1,32], index: 5, kind: input, shape index: {}]   ;;  %s2843_s6 = inlined_call_operand.vmem [shape: bf16[32,96], index: 6, kind: input, shape index: {}]   ;;  %s2844_s7 = inlined_call_operand.vmem [shape: f32[1,96], index: 7, kind: input, shape index: {}]   ;;  %s2845_s8 = inlined_call_operand.vmem [shape: bf16[4,8,32], index: 8, kind: input, shape index: {}]   ;;  %s2846_s9 = inlined_call_operand.vmem [shape: f32[1,32], index: 9, kind: input, shape index: {}]   ;;  %s2847_s10 = inlined_call_operand.vmem [shape: f32[1,32], index: 10, kind: input, shape index: {}]   ;;  %s2848_s11 = inlined_call_operand.vmem [shape: f32[1,32], index: 11, kind: input, shape index: {}]   ;;  %s2849_s12 = inlined_call_operand.vmem [shape: bf16[32,64], index: 12, kind: input, shape index: {}]   ;;  %s2850_s13 = inlined_call_operand.vmem [shape: f32[1,64], index: 13, kind: input, shape index: {}]   ;;  %s2851_s14 = inlined_call_operand.vmem [shape: bf16[64,32], index: 14, kind: input, shape index: {}]   ;;  %s2852_s15 = inlined_call_operand.vmem [shape: f32[1,32], index: 15, kind: input, shape index: {}]   ;;  %s2853_s16 = inlined_call_operand.vmem [shape: f32[1,32], index: 16, kind: input, shape index: {}]   ;;  %s2854_s17 = inlined_call_operand.vmem [shape: f32[1,32], index: 17, kind: input, shape index: {}]   ;;  %s2855_s18 = inlined_call_operand.hbm [shape: f32[32,32], index: 18, kind: output, shape index: {}]  }
   0x1   :  { %2861 = sst [smem:[#allocation9_spill]] %s2837_s0 }
   0x2   :  { %2862 = sst [smem:[#allocation10_spill]] %s2838_s1 }
   0x3   :  { %2863 = sst [smem:[#allocation11_spill]] %s2839_s2 }
   0x4   :  { %2864 = sst [smem:[#allocation12_spill]] %s2841_s4 }
   0x5   :  { %2865 = sst [smem:[#allocation13_spill]] %s2843_s6 }
   0x6   :  { %2866 = sst [smem:[#allocation14_spill]] %s2844_s7 }
   0x7   :  { %2867 = sst [smem:[#allocation15_spill]] %s2845_s8 }
   0x8   :  { %23 = vsyncpa [#allocation3], 0 }
   0x9   :  { %25 = vsyncpa [#allocation3 + $0x1], 0  ;;  %s2369_s27 = smov 0   ;;  %s2371_s28 = smov 0  }
   0xa   :  { %s2373_s29 = smov 0   ;;  %s2375_s30 = smov 0  }
   0xb LB: > { %2868 = sst [smem:[#allocation5_spill]] %s2238_s29  ;;  %s2390_s0 = sadd.s32 4294967295, %s2242_s30   ;;  %s2242_s30 = sphi %s2375_s30, %s2885_s30   ;;  %s2238_s29 = sphi %s2373_s29, %s2887_s29   ;;  %s2234_s28 = sphi %s2371_s28, %s2889_s28   ;;  %s2230_s27 = sphi %s2369_s27, %s2888_s27  }
   0xc   : > { %s1846_s19 = sadd.s32 4294967294, %s2242_s30   ;;  %s2394_s1 = sadd.s32 1, %s2242_s30  }
   0xd   : > { %2869 = sst [smem:[#allocation6_spill]] %s2394_s1  ;;  %s426_s20 = sadd.s32 1, %s2238_s29 }
   0xe   : > { %s423_s21 = ssub.s32 %s2242_s30, %s2394_s1  ;;  %p436_p0 = scmp.ne.s32.totalorder %s2238_s29, %s2234_s28 }
   0xf   : > { %p424_p1 = scmp.eq.s32.totalorder %s423_s21, 0  ;;  %p437_p2 = scmp.eq.s32.totalorder %s2390_s0, 1 }
  0x10   : > { %p442_p3 = scmp.ne.s32.totalorder %s2234_s28, %s2230_s27  ;;  %p443_p4 = scmp.eq.s32.totalorder %s1846_s19, 1 }
  0x11   : > { %s2405_s22 = scalar_select %p424_p1, %s2238_s29, %s426_s20  }
  0x12   : > { %p2407_p5 = por %p437_p2, %p436_p0  ;;  %p2411_p6 = por %p443_p4, %p442_p3 }
  0x13   : > { %2870 = sst [smem:[#allocation7_spill]] %s2405_s22  ;;  %p1849_p7 = scmp.ge.s32.totalorder %s2242_s30, 1 }
  0x14   : > { %s2872_s23 = scalar_select %p2411_p6, 1, 0 }
  0x15   : > { %p524_p8 = scmp.lt.s32.totalorder %s2242_s30, 3 }
  0x16   : > { %2873 = sst [smem:[#allocation8_spill]] %s2872_s23 }
  0x17   : > { %p525_p9 = pnand %p1849_p7, %p524_p8 }
  0x18   : > { %s1851_s24 = sshll.u32 (!%p525_p9), %s2390_s0, 1  ;;  %vm634_vm0 = vcmask (!%p525_p9), 130048   ;;  %s2874_s20 = sld [smem:[#allocation9_spill]] (!%p525_p9)  ;;  %v2256_v20 = vmov (!%p525_p9), 0.0   ;;  %v2483_v25 = vld [vmem:[%s2846_s9] ss:$0 sm:$0xff] (!%p525_p9) }
  0x19   : > { %528 = sbr.rel (%p525_p9) target bundleno = 3840 (0xf00), region = 92  ;;  %p582_p10 = scmp.lt.s32.totalorder (!%p525_p9), %s1851_s24, 3  ;;  %1933 = vmatprep.subr.bf16.mxu0 (!%p525_p9), %v2256_v20  ;;  %v2488_v26 = vld [vmem:[%s2847_s10] ss:$0 sm:$0xff] (!%p525_p9)  ;;  %vm2257_vm1 = vmmov (!%p525_p9), 0  }
  0x1a   : > { %p587_p11 = scmp.lt.s32.totalorder (!%p525_p9), %s2390_s0, 1  ;;  %s2875_s6 = sld [smem:[#allocation13_spill]] (!%p525_p9)  ;;  %1935 = vmatprep.mubr.msk.bf16.mxu0 (!%p525_p9), %vm2257_vm1, %v2256_v20  ;;  %v2493_v27 = vld [vmem:[%s2848_s11] ss:$0 sm:$0xff] (!%p525_p9)  ;;  %v2503_v29 = vld [vmem:[%s2849_s12 + $0x4] sm:$0xf] (!%p525_p9) }
  0x1b   : > { %s2876_s7 = sld [smem:[#allocation14_spill]] (!%p525_p9)  ;;  %s2877_s8 = sld [smem:[#allocation15_spill]] (!%p525_p9)  ;;  %v2498_v28 = vld [vmem:[%s2849_s12] sm:$0xf] (!%p525_p9)  ;;  %v2508_v30 = vld [vmem:[%s2849_s12 + $0x8] sm:$0xf] (!%p525_p9) }
  0x1c   : > { %s2878_s4 = sld [smem:[#allocation12_spill]] (!%p525_p9)  ;;  %v2513_v31 = vld [vmem:[%s2849_s12 + $0xc] sm:$0xf] (!%p525_p9)  ;;  %v2518_v32 = vld [vmem:[%s2850_s13] ss:$0 sm:$0xff] (!%p525_p9)  ;;  %s2880_s26 = sld [smem:[#allocation11_spill]] (!%p525_p9) }
  0x1d   : > { %v2526_v33 = vld [vmem:[%s2851_s14] sm:$0xf] (!%p525_p9)  ;;  %v2531_v34 = vld [vmem:[%s2851_s14 + $0x4] sm:$0xf] (!%p525_p9)  ;;  %v2536_v35 = vld [vmem:[%s2851_s14 + $0x8] sm:$0xf] (!%p525_p9) }
  0x1e   : > { %v2541_v36 = vld [vmem:[%s2851_s14 + $0xc] sm:$0xf] (!%p525_p9)  ;;  %v2546_v37 = vld [vmem:[%s2851_s14 + $0x10] sm:$0xf] (!%p525_p9)  ;;  %v2551_v38 = vld [vmem:[%s2851_s14 + $0x14] sm:$0xf] (!%p525_p9) }
  0x1f   : > { %v2556_v39 = vld [vmem:[%s2851_s14 + $0x18] sm:$0xf] (!%p525_p9)  ;;  %v2561_v40 = vld [vmem:[%s2851_s14 + $0x1c] sm:$0xf] (!%p525_p9)  ;;  %v2566_v41 = vld [vmem:[%s2852_s15] ss:$0 sm:$0xff] (!%p525_p9) }
  0x20   : > { %s2891_s24 = smov (!%p582_p10, %s1851_s24), 3  ;;  %v2430_v14 = vld [vmem:[%s2875_s6] sm:$0xf]  ;;  %v2435_v15 = vld [vmem:[%s2875_s6 + $0x4] sm:$0xf]  ;;  %s2597_s22 = smov 0  }
  0x21   : > { %s1852_s25 = sshll.u32 %s2891_s24, 3  ;;  %s2860_s24 = sand.u32 1, %s2234_s28   ;;  %v2444_v16 = vld [vmem:[%s2875_s6 + $0x8] sm:$0xf]  ;;  %v2449_v17 = vld [vmem:[%s2875_s6 + $0xc] sm:$0xf] }
  0x22   : > { %s585_s21 = scalar_lea.vmem %s2874_s20, %s1852_s25  ;;  %v2454_v18 = vld [vmem:[%s2876_s7] ss:$0 sm:$0xff]  ;;  %v2468_v22 = vld [vmem:[%s2877_s8 + $0x4] sm:$0xf]  ;;  %v2473_v23 = vld [vmem:[%s2877_s8 + $0x8] sm:$0xf] }
  0x23   : > { %v632_v0 = vld [vmem:[%s585_s21] sm:$0xff]  ;;  %v633_v1 = vld [vmem:[%s585_s21 + $0x8] sm:$0xff]  ;;  %s2439_s21 = sshll.u32 %s2860_s24, 4  ;;  %s2879_s6 = sld [smem:[#allocation10_spill]] }
  0x24   : > { %v635_v2 = vsel %vm634_vm0, %v632_v0, 0.0  ;;  %v638_v3 = vsel %vm634_vm0, %v633_v1, 0.0  ;;  %v2459_v19 = vld [vmem:[%s2877_s8] sm:$0xf]  ;;  %s588_s24 = scalar_select %p587_p11, %s2390_s0, 1 }
  0x25   : > { %636 = vadd.xlane.f32.xlu0 %v635_v2  ;;  %v2119_v21 = vld [vmem:[%s2878_s4] sm:$0xff]   ;;  %v2478_v24 = vld [vmem:[%s2877_s8 + $0xc] sm:$0xf]  ;;  %s2591_s29 = scalar_lea.vmem [#allocation2], %s2439_s21 }
  0x26   : > { %1934 = vmatpush3.bf16.msra.mxu0 %v2119_v21  ;;  %v2571_v42 = vld [vmem:[%s2853_s16] ss:$0 sm:$0xff] }
  0x27   : > { %v2576_v43 = vld [vmem:[%s2854_s17] ss:$0 sm:$0xff] }
  0x28   : > { %v1854_v53 = vld [vmem:[%s2880_s26] ss:$0 sm:$0xff] }
  0x29   : > { %639 = vadd.xlane.f32.xlu0 %v638_v3  ;;  %s589_s7 = scalar_lea.vmem %s2879_s6, %s588_s24  ;;  %v1855_v57 = vld [vmem:[%s2840_s3] ss:$0 sm:$0xff] }
  0x2a   : > { %v2578_v44 = vld [vmem:[%s589_s7] ss:$0 sm:$0xff] }
  0x2b   : > { %v1856_v62 = vld [vmem:[%s2842_s5] ss:$0 sm:$0xff] }
  0xb2   : > { %v637_v4 = vpop.xlane.xlu0 %636 }
  0xb3   : > { %v642_v5 = vmul.f32 0.0625, %v637_v4 }
  0xb5   : > { %v644_v6 = vsub.f32 %v632_v0, %v642_v5 }
  0xb6   : > { %v640_v7 = vpop.xlane.xlu0 %639 }
  0xb7   : > { %v643_v8 = vmul.f32 0.0625, %v640_v7  ;;  %v646_v9 = vmul.f32 %v644_v6, %v644_v6 }
  0xb9   : > { %v645_v10 = vsub.f32 %v633_v1, %v643_v8  ;;  %v648_v11 = vsel %vm634_vm0, %v646_v9, 0.0 }
  0xba   : > { %649 = vadd.xlane.f32.xlu1 %v648_v11 }
  0xbb   : > { %v647_v12 = vmul.f32 %v645_v10, %v645_v10 }
  0xbd   : > { %v651_v13 = vsel %vm634_vm0, %v647_v12, 0.0 }
  0xbe   : > { %652 = vadd.xlane.f32.xlu1 %v651_v13 }
 0x147   : > { %v650_v45 = vpop.xlane.xlu1 %649 }
 0x148   : > { %v654_v46 = vmul.f32 0.0625, %v650_v45 }
 0x14a   : > { %v656_v47 = vadd.f32 1e-12, %v654_v46 }
 0x14b   : > { %v653_v48 = vpop.xlane.xlu1 %652 }
 0x14c   : > { %2120 = vrsqrt.f32 %v656_v47  ;;  %v655_v49 = vmul.f32 0.0625, %v653_v48 }
 0x14e   : > { %v657_v50 = vadd.f32 1e-12, %v655_v49 }
 0x150   : > { %2122 = vrsqrt.f32 %v657_v50 }
 0x156   : > { %v2121_v51 = vpop.eup %2120 }
 0x157   : > { %v660_v52 = vmul.f32 %v2121_v51, %v644_v6 }
 0x159   : > { %v668_v56 = vmul.f32 %v1854_v53, %v660_v52 }
 0x15a   : > { %v2123_v54 = vpop.eup %2122 }
 0x15b   : > { %v661_v55 = vmul.f32 %v2123_v54, %v645_v10  ;;  %v676_v59 = vadd.f32 %v1855_v57, %v668_v56 }
 0x15d   : > { %v669_v58 = vmul.f32 %v1854_v53, %v661_v55 }
 0x15f   : > { %v677_v60 = vadd.f32 %v1855_v57, %v669_v58 }
 0x161   : > { %v678_v61 = vpack.c.bf16 %v677_v60, %v676_v59 }
 0x163   : > { %1936 = vmatmul.mubr.msk.bf16.vlgmr.msra.gmra.mrb[0].mxu0 %vm634_vm0, %v678_v61 }
 0x236   : > { %v728_v63 = vpop.f32.mrb[0].mxu0 }
 0x237   : > { %v729_v0 = vadd.f32 %v1856_v62, %v728_v63   ;;  %v1937_v1 = vpop.f32.mrb[1].mxu0 }
 0x238   : > { %v731_v2 = vpop.f32.mrb[2].mxu0 }
 0x239   : > { %v732_v3 = vadd.f32 %v1856_v62, %v731_v2   ;;  %v1938_v4 = vpop.f32.mrb[3].mxu0 }
 0x23a LB: >> { %v1860_v5 = vcombine.low %v2430_v14, %v2435_v15  ;;  %v2258_v6 = vmov 0.0   ;;  %vm2259_vm2 = vmmov 0   ;;  %v1861_v7 = vcombine.low %v2444_v16, %v2449_v17  ;;  %s2260_s21 = smov 96   ;;  %s2261_s1 = smov 120   ;;  %s2254_s22 = sphi %s2597_s22, %s740_s22   ;;  %v2250_v0 = vphi %v729_v0, %v2882_v0   ;;  %v2246_v3 = vphi %v732_v3, %v2881_v3  }
 0x23b   : >> { %1939 = vmatprep.subr.bf16.mxu1 %v2258_v6  ;;  %1943 = vmatprep.mubr.msk.bf16.mxu1 %vm2259_vm2, %v2258_v6  ;;  %v743_v8 = vpack.c.bf16 %v2246_v3, %v2250_v0  ;;  %vm762_vm3 = vcmask 261120   ;;  %s2262_s23 = smov 88   ;;  %vm814_vm4 = vcmask 64512   ;;  %s2263_s24 = smov 56   ;;  %vm1059_vm5 = vcmask 1043456  }
 0x23c   : >> { %1940 = vmatpush3.bf16.msra.mxu1 %v1860_v5  ;;  %1953 = vmatprep.subr.bf16.mxu0 %v2258_v6  ;;  %s2264_s25 = smov 64   ;;  %s2265_s4 = smov 112   ;;  %vm1658_vm6 = vcmask 523264  }
 0x23d   : >> { %1941 = vmatprep.subr.bf16.mxu1 %v2258_v6  ;;  %1955 = vmatprep.mubr.msk.bf16.mxu0 %vm2259_vm2, %v2258_v6  ;;  %s2266_s8 = smov 80   ;;  %s2267_s26 = smov 72  }
 0x23e   : >> { %s2268_s7 = smov 48   ;;  %s2269_s6 = smov 104  }
 0x23f   : >> { %s2270_s19 = smov 40   ;;  %s740_s22 = sadd.s32 1, %s2254_s22  }
 0x240   : >> { %1942 = vmatpush3.bf16.msra.mxu1 %v1861_v7  ;;  %p737_p12 = scmp.ge.s32.totalorder %s740_s22, 2  }
 0x241   : >> { %1947 = vmatprep.subr.bf16.mxu1 %v2258_v6  ;;  %s1895_s20 = sshll.u32 (%p737_p12), %s2390_s0, 8  ;;  %s2883_s22 = sand.u32 (%p737_p12), 1, %s2234_s28  }
 0x242   : > { %s2271_s0 = smov (%p737_p12), [#allocation2]  }
 0x243   : >> { %1944 = vmatmul.mubr.msk.bf16.vlgmr.msra.gmra.mrb[0].mxu1 %vm762_vm3, %v743_v8 }
 0x244   : >> { %1949 = vmatprep.mubr.msk.bf16.mxu1 %vm2259_vm2, %v2258_v6 }
 0x316   : >> { %v800_v9 = vpop.f32.mrb[0].mxu1 }
 0x317   : >> { %v801_v10 = vadd.f32 %v2454_v18, %v800_v9  ;;  %v1945_v11 = vpop.f32.mrb[1].mxu1 }
 0x318   : >> { %v803_v12 = vpop.f32.mrb[2].mxu1 }
 0x319   : >> { %v804_v13 = vadd.f32 %v2454_v18, %v803_v12  ;;  %v1946_v20 = vpop.f32.mrb[3].mxu1  ;;  %v807_v21 = vmul.f32 0.35355338, %v801_v10 }
 0x31b   : >> { %v808_v45 = vmul.f32 0.35355338, %v804_v13  ;;  %v2627_v46 = vpack.c.bf16 %v804_v13, %v801_v10 }
 0x31d   : >> { %v2629_v47 = vpack.c.bf16 %v808_v45, %v807_v21  ;;  %812 = vrot.lane.b32.xlu0 %v2627_v46, %s2260_s21 }
 0x31f   : >> { %934 = vrot.lane.b32.xlu1 %v2629_v47, %s2261_s1 }
 0x321   : >> { %936 = vrot.lane.b32.xlu0 %v2627_v46, %s2262_s23  ;;  %s2789_s23 = scalar_lea.hbm (%p737_p12), %s2855_s18, %s1895_s20 }
 0x38f   : >> { %v813_v48 = vpop.permute.xlu0 %812 }
 0x390   : >> { %v819_v49 = vsel %vm814_vm4, %v813_v48, 0 }
 0x391   : >> { %1948 = vmatpush3.bf16.xpose.msra.mxu1 %v819_v49  ;;  %v935_v52 = vpop.permute.xlu1 %934 }
 0x392   : >> { %1959 = vmatprep.subr.bf16.mxu1 %v2258_v6 }
 0x393   : >> { %v937_v50 = vpop.permute.xlu0 %936 }
 0x394   : >> { %v942_v51 = vsel %vm814_vm4, %v937_v50, 0 }
 0x398   : >> { %1950 = vmatmul.mubr.msk.bf16.vlgmr.msra.gmra.mrb[4].mxu1 %vm814_vm4, %v2629_v47 }
 0x399   : >> { %1960 = vmatpush3.bf16.xpose.msra.mxu1 %v942_v51  ;;  %1961 = vmatprep.mubr.msk.bf16.mxu1 %vm2259_vm2, %v2258_v6 }
 0x39a   : >> { %1971 = vmatprep.subr.bf16.mxu1 %v2258_v6 }
 0x3a0   : >> { %1962 = vmatmul.mubr.msk.bf16.vlgmr.msra.gmra.mrb[8].mxu1 %vm814_vm4, %v935_v52 }
 0x3a1   : >> { %1973 = vmatprep.mubr.msk.bf16.mxu1 %vm2259_vm2, %v2258_v6 }
 0x46b   : >> { %v855_v53 = vpop.f32.mrb[4].mxu1 }
 0x46c   : >> { %v856_v54 = vadd.f32 %v2578_v44, %v855_v53  ;;  %v1951_v55 = vpop.f32.mrb[5].mxu1 }
 0x46d   : >> { %v858_v56 = vpop.f32.mrb[6].mxu1 }
 0x46e   : >> { %v859_v57 = vadd.f32 %v2578_v44, %v858_v56  ;;  %v1952_v58 = vpop.f32.mrb[7].mxu1  ;;  %v862_v59 = vsel %vm634_vm0, %v856_v54, -inf }
 0x46f   : >> { %863 = vmax.xlane.f32.xlu1 %v862_v59 }
 0x470   : >> { %v865_v60 = vsel %vm634_vm0, %v859_v57, -inf }
 0x471   : >> { %866 = vmax.xlane.f32.xlu0 %v865_v60 }
 0x473   : >> { %v978_v61 = vpop.f32.mrb[8].mxu1 }
 0x474   : >> { %v979_v62 = vadd.f32 %v2578_v44, %v978_v61  ;;  %v1963_v63 = vpop.f32.mrb[9].mxu1 }
 0x475   : >> { %v981_v1 = vpop.f32.mrb[10].mxu1  ;;  %v1108_v63 = vsel %vm1059_vm5, %v2459_v19, 0 }
 0x476   : >> { %v982_v2 = vadd.f32 %v2578_v44, %v981_v1  ;;  %v1964_v4 = vpop.f32.mrb[11].mxu1  ;;  %v985_v5 = vsel %vm634_vm0, %v979_v62, -inf  ;;  %v1061_v1 = vsel %vm1059_vm5, %v2468_v22, 0 }
 0x477   : >> { %986 = vmax.xlane.f32.xlu0 %v985_v5  ;;  %1972 = vmatpush3.bf16.msra.mxu1 %v1061_v1 }
 0x478   : >> { %v988_v7 = vsel %vm634_vm0, %v982_v2, -inf  ;;  %1983 = vmatprep.subr.bf16.mxu1 %v2258_v6 }
 0x479   : >> { %989 = vmax.xlane.f32.xlu1 %v988_v7 }
 0x48a   : >> { %1004 = vrot.lane.b32.xlu1 %v2627_v46, %s2263_s24  ;;  %s1764_s24 = sshll.u32 (%p737_p12), %s2591_s29, 4  ;;  %s2792_s24 = int_to_ptr.vmem [resolvable:$true] %s1764_s24 }
 0x48d   : >> { %881 = vrot.lane.b32.xlu0 %v2627_v46, %s2264_s25  ;;  %s2796_s25 = scalar_lea.sflag (%p737_p12), [#allocation3], %s2883_s22 }
 0x4fc   : >> { %v864_v8 = vpop.xlane.xlu1 %863 }
 0x4fd   : >> { %v868_v9 = vsub.f32 %v856_v54, %v864_v8 }
 0x4fe   : >> { %v867_v10 = vpop.xlane.xlu0 %866 }
 0x4ff   : >> { %v870_v11 = vmul.f32 1.442695, %v868_v9  ;;  %v869_v12 = vsub.f32 %v859_v57, %v867_v10 }
 0x501   : >> { %v872_v13 = vmul.f32 1.442695, %v869_v12  ;;  %2124 = vpow2.f32 %v870_v11 }
 0x503   : >> { %2126 = vpow2.f32 %v872_v13 }
 0x504   : >> { %v987_v20 = vpop.xlane.xlu0 %986 }
 0x505   : >> { %v991_v21 = vsub.f32 %v979_v62, %v987_v20 }
 0x506   : >> { %v990_v45 = vpop.xlane.xlu1 %989 }
 0x507   : >> { %v993_v48 = vmul.f32 1.442695, %v991_v21  ;;  %v992_v49 = vsub.f32 %v982_v2, %v990_v45 }
 0x508   : >> { %v882_v50 = vpop.permute.xlu0 %881 }
 0x509   : >> { %2128 = vpow2.f32 %v993_v48  ;;  %v995_v51 = vmul.f32 1.442695, %v992_v49  ;;  %1954 = vmatpush3.bf16.msra.mxu0 %v882_v50 }
 0x50a   : >> { %1965 = vmatprep.subr.bf16.mxu0 %v2258_v6  ;;  %v1005_v55 = vpop.permute.xlu1 %1004 }
 0x50b   : >> { %2130 = vpow2.f32 %v995_v51  ;;  %v2125_v52 = vpop.eup %2124 }
 0x50c   : >> { %v874_v61 = vsel %vm634_vm0, %v2125_v52, 0.0 }
 0x50d   : >> { %v2127_v53 = vpop.eup %2126 }
 0x50e   : >> { %v880_v54 = vpack.c.bf16 %v2127_v53, %v2125_v52  ;;  %v877_v62 = vsel %vm634_vm0, %v2127_v53, 0.0 }
 0x510   : >> { %1956 = vmatmul.mubr.msk.bf16.vlgmr.msra.gmra.mrb[0].mxu0 %vm634_vm0, %v880_v54 }
 0x511   : >> { %1966 = vmatpush3.bf16.msra.mxu0 %v1005_v55  ;;  %1967 = vmatprep.mubr.msk.bf16.mxu0 %vm2259_vm2, %v2258_v6 }
 0x512   : >> { %1977 = vmatprep.subr.bf16.mxu0 %v2258_v6 }
 0x513   : >> { %v2129_v56 = vpop.eup %2128 }
 0x514   : >> { %v997_v57 = vsel %vm634_vm0, %v2129_v56, 0.0 }
 0x515   : >> { %v2131_v58 = vpop.eup %2130  ;;  %998 = vadd.xlane.f32.xlu1 %v997_v57 }
 0x516   : >> { %v1000_v59 = vsel %vm634_vm0, %v2131_v58, 0.0  ;;  %v1003_v60 = vpack.c.bf16 %v2131_v58, %v2129_v56 }
 0x517   : >> { %1001 = vadd.xlane.f32.xlu0 %v1000_v59 }
 0x518   : >> { %1968 = vmatmul.mubr.msk.bf16.vlgmr.msra.gmra.mrb[4].mxu0 %vm634_vm0, %v1003_v60 }
 0x519   : >> { %1979 = vmatprep.mubr.msk.bf16.mxu0 %vm2259_vm2, %v2258_v6  ;;  %1978 = vmatpush3.bf16.msra.mxu0 %v1108_v63 }
 0x51a   : >> { %1989 = vmatprep.subr.bf16.mxu0 %v2258_v6 }
 0x526   : >> { %1151 = vrot.lane.b32.xlu1 %v2629_v47, %s2265_s4  ;;  %s2168_s4 = scalar_lea.vmem (%p737_p12), %s2792_s24, 256 }
 0x527   : > { %p2169_p13 = scmp.ne.s32.totalorder (%p737_p12), %s2792_s24, %s2168_s4 }
 0x529   : > { %p2170_p0 = pnand (%p737_p12), %p2169_p13, %p2407_p5 }
 0x52b   : > { %p2171_p1 = pneg (%p737_p12), %p2170_p0 }
 0x52d   : >> { %1153 = vrot.lane.b32.xlu0 %v2627_v46, %s2266_s8  ;;  %s2172_s8 = sshll.u32 (%p737_p12), %s2271_s0, 4  ;;  %s2173_s8 = int_to_ptr.vmem [resolvable:$false] %s2172_s8 }
 0x52e   : > { %p2175_p2 = scmp.lt.s32.totalorder (%p737_p12), %s2792_s24, %s2173_s8 }
 0x54a   : >> { %875 = vadd.xlane.f32.xlu1 %v874_v61 }
 0x54c   : >> { %878 = vadd.xlane.f32.xlu0 %v877_v62 }
 0x5a2   : >> { %v999_v2 = vpop.xlane.xlu1 %998 }
 0x5a4   : >> { %v1002_v4 = vpop.xlane.xlu0 %1001 }
 0x5a6   : >> { %v1152_v5 = vpop.permute.xlu1 %1151 }
 0x5a8   : >> { %v1154_v7 = vpop.permute.xlu0 %1153 }
 0x5a9   : >> { %v1159_v59 = vsel %vm814_vm4, %v1154_v7, 0 }
 0x5d7   : >> { %v876_v8 = vpop.xlane.xlu1 %875 }
 0x5d8   : >> { %2132 = vrcp.f32 %v876_v8 }
 0x5d9   : >> { %v879_v9 = vpop.xlane.xlu0 %878 }
 0x5da   : >> { %2134 = vrcp.f32 %v879_v9 }
 0x5db   : >> { %2136 = vrcp.f32 %v999_v2 }
 0x5dc   : >> { %2138 = vrcp.f32 %v1002_v4 }
 0x5e2   : >> { %v2133_v10 = vpop.eup %2132 }
 0x5e3   : >> { %v921_v11 = vpop.f32.mrb[0].mxu0 }
 0x5e4   : >> { %v2135_v12 = vpop.eup %2134  ;;  %v1957_v13 = vpop.f32.mrb[1].mxu0  ;;  %v929_v21 = vmul.f32 %v2133_v10, %v921_v11 }
 0x5e5   : >> { %v924_v20 = vpop.f32.mrb[2].mxu0  ;;  %v2137_v51 = vpop.eup %2136 }
 0x5e6   : >> { %v931_v45 = vmul.f32 %v2135_v12, %v924_v20  ;;  %v1958_v48 = vpop.f32.mrb[3].mxu0  ;;  %v2139_v53 = vpop.eup %2138 }
 0x5e8   : >> { %v932_v49 = vpack.c.bf16 %v931_v45, %v929_v21 }
 0x5ea   : >> { %1980 = vmatmul.mubr.msk.bf16.vlgmr.msra.gmra.mrb[8].mxu0 %vm814_vm4, %v932_v49 }
 0x5eb   : >> { %v1044_v50 = vpop.f32.mrb[4].mxu0  ;;  %1991 = vmatprep.mubr.msk.bf16.mxu0 %vm2259_vm2, %v2258_v6 }
 0x5ec   : >> { %v1969_v52 = vpop.f32.mrb[5].mxu0  ;;  %v1052_v55 = vmul.f32 %v2137_v51, %v1044_v50 }
 0x5ed   : >> { %v1047_v54 = vpop.f32.mrb[6].mxu0 }
 0x5ee   : >> { %v1054_v56 = vmul.f32 %v2139_v53, %v1047_v54  ;;  %v1970_v57 = vpop.f32.mrb[7].mxu0 }
 0x5f0   : >> { %v1055_v58 = vpack.c.bf16 %v1054_v56, %v1052_v55 }
 0x5f2   : >> { %1974 = vmatmul.mubr.msk.bf16.vlgmr.msra.gmra.mrb[12].mxu1 %vm814_vm4, %v1055_v58 }
 0x5f3   : >> { %1984 = vmatpush3.bf16.xpose.msra.mxu1 %v1159_v59  ;;  %1985 = vmatprep.mubr.msk.bf16.mxu1 %vm2259_vm2, %v2258_v6 }
 0x5f4   : >> { %1995 = vmatprep.subr.bf16.mxu1 %v2258_v6 }
 0x5fa   : >> { %1986 = vmatmul.mubr.msk.bf16.vlgmr.msra.gmra.mrb[16].mxu1 %vm814_vm4, %v1152_v5 }
 0x5fb   : >> { %1997 = vmatprep.mubr.msk.bf16.mxu1 %vm2259_vm2, %v2258_v6 }
 0x6bd   : >> { %v1144_v60 = vpop.f32.mrb[8].mxu0 }
 0x6be   : >> { %v1981_v61 = vpop.f32.mrb[9].mxu0 }
 0x6bf   : >> { %v1147_v62 = vpop.f32.mrb[10].mxu0 }
 0x6c0   : >> { %v1982_v63 = vpop.f32.mrb[11].mxu0 }
 0x6c5   : >> { %v1097_v1 = vpop.f32.mrb[12].mxu1 }
 0x6c6   : >> { %v2686_v2 = vadd.f32 %v1144_v60, %v1097_v1  ;;  %v1975_v4 = vpop.f32.mrb[13].mxu1 }
 0x6c7   : >> { %v1100_v7 = vpop.f32.mrb[14].mxu1 }
 0x6c8   : >> { %v2688_v8 = vadd.f32 %v1147_v62, %v1100_v7  ;;  %v1976_v9 = vpop.f32.mrb[15].mxu1  ;;  %v1277_v62 = vsel %vm1059_vm5, %v2473_v23, 0 }
 0x6c9   : >> { %1996 = vmatpush3.bf16.msra.mxu1 %v1277_v62 }
 0x6ca   : >> { %2007 = vmatprep.subr.bf16.mxu1 %v2258_v6 }
 0x6cd   : >> { %v1195_v10 = vpop.f32.mrb[16].mxu1 }
 0x6ce   : >> { %v1196_v11 = vadd.f32 %v2578_v44, %v1195_v10  ;;  %v1987_v12 = vpop.f32.mrb[17].mxu1 }
 0x6cf   : >> { %v1198_v5 = vpop.f32.mrb[18].mxu1 }
 0x6d0   : >> { %v1199_v13 = vadd.f32 %v2578_v44, %v1198_v5  ;;  %v1988_v20 = vpop.f32.mrb[19].mxu1  ;;  %v1202_v21 = vsel %vm634_vm0, %v1196_v11, -inf }
 0x6d1   : >> { %1203 = vmax.xlane.f32.xlu0 %v1202_v21 }
 0x6d2   : >> { %v1205_v45 = vsel %vm634_vm0, %v1199_v13, -inf }
 0x6d3   : >> { %1206 = vmax.xlane.f32.xlu1 %v1205_v45 }
 0x6e4   : >> { %1324 = vrot.lane.b32.xlu1 %v2627_v46, %s2267_s26  ;;  %s2174_s26 = scalar_lea.vmem (%p737_p12), %s2173_s8, 512 }
 0x6e5   : > { %p2176_p3 = scmp.lt.s32.totalorder (%p737_p12), %s2174_s26, %s2168_s4 }
 0x6e7   : >> { %1221 = vrot.lane.b32.xlu0 %v2627_v46, %s2268_s7  ;;  %p2177_p4 = por (%p737_p12), %p2176_p3, %p2175_p2 }
 0x6e8   : >> { %1322 = vrot.lane.b32.xlu1 %v2629_v47, %s2269_s6 }
 0x6e9   : > { %p2178_p7 = pnand (%p737_p12), %p2177_p4, %p2171_p1 }
 0x75e   : >> { %v1204_v48 = vpop.xlane.xlu0 %1203 }
 0x75f   : >> { %v1208_v49 = vsub.f32 %v1196_v11, %v1204_v48 }
 0x760   : >> { %v1207_v50 = vpop.xlane.xlu1 %1206 }
 0x761   : >> { %v1210_v51 = vmul.f32 1.442695, %v1208_v49  ;;  %v1209_v52 = vsub.f32 %v1199_v13, %v1207_v50 }
 0x762   : >> { %v1222_v53 = vpop.permute.xlu0 %1221 }
 0x763   : >> { %2140 = vpow2.f32 %v1210_v51  ;;  %v1212_v54 = vmul.f32 1.442695, %v1209_v52  ;;  %1990 = vmatpush3.bf16.msra.mxu0 %v1222_v53 }
 0x764   : >> { %2001 = vmatprep.subr.bf16.mxu0 %v2258_v6  ;;  %v1325_v58 = vpop.permute.xlu1 %1324 }
 0x765   : >> { %2142 = vpow2.f32 %v1212_v54  ;;  %v1330_v60 = vsel %vm814_vm4, %v1325_v58, 0 }
 0x768   : >> { %v1323_v61 = vpop.permute.xlu1 %1322 }
 0x76d   : >> { %v2141_v55 = vpop.eup %2140 }
 0x76e   : >> { %v1214_v56 = vsel %vm634_vm0, %v2141_v55, 0.0 }
 0x76f   : >> { %v2143_v57 = vpop.eup %2142  ;;  %1215 = vadd.xlane.f32.xlu0 %v1214_v56 }
 0x770   : >> { %v1217_v47 = vsel %vm634_vm0, %v2143_v57, 0.0  ;;  %v1220_v59 = vpack.c.bf16 %v2143_v57, %v2141_v55 }
 0x771   : >> { %1218 = vadd.xlane.f32.xlu1 %v1217_v47 }
 0x772   : >> { %1992 = vmatmul.mubr.msk.bf16.vlgmr.msra.gmra.mrb[12].mxu0 %vm634_vm0, %v1220_v59 }
 0x773   : >> { %2002 = vmatpush3.bf16.xpose.msra.mxu0 %v1330_v60  ;;  %2003 = vmatprep.mubr.msk.bf16.mxu0 %vm2259_vm2, %v2258_v6 }
 0x774   : >> { %2013 = vmatprep.subr.bf16.mxu0 %v2258_v6 }
 0x77a   : >> { %2004 = vmatmul.mubr.msk.bf16.vlgmr.msra.gmra.mrb[16].mxu0 %vm814_vm4, %v1323_v61 }
 0x77b   : >> { %2015 = vmatprep.mubr.msk.bf16.mxu0 %vm2259_vm2, %v2258_v6 }
 0x782   : >> { %1392 = vrot.lane.b32.xlu1 %v2627_v46, %s2270_s19 }
 0x7fc   : >> { %v1216_v63 = vpop.xlane.xlu0 %1215 }
 0x7fd   : >> { %2144 = vrcp.f32 %v1216_v63 }
 0x7fe   : >> { %v1219_v1 = vpop.xlane.xlu1 %1218 }
 0x7ff   : >> { %2146 = vrcp.f32 %v1219_v1 }
 0x802   : >> { %v1393_v46 = vpop.permute.xlu1 %1392 }
 0x807   : >> { %v2145_v7 = vpop.eup %2144 }
 0x809   : >> { %v2147_v10 = vpop.eup %2146 }
 0x845   : >> { %v1261_v4 = vpop.f32.mrb[12].mxu0 }
 0x846   : >> { %v1993_v9 = vpop.f32.mrb[13].mxu0  ;;  %v1269_v12 = vmul.f32 %v2145_v7, %v1261_v4 }
 0x847   : >> { %v1264_v11 = vpop.f32.mrb[14].mxu0 }
 0x848   : >> { %v1271_v5 = vmul.f32 %v2147_v10, %v1264_v11  ;;  %v1994_v13 = vpop.f32.mrb[15].mxu0 }
 0x84a   : >> { %v1272_v20 = vpack.c.bf16 %v1271_v5, %v1269_v12  ;;  %v1448_v12 = vsel %vm1059_vm5, %v2478_v24, 0 }
 0x84b   : >> { %2014 = vmatpush3.bf16.msra.mxu0 %v1448_v12 }
 0x84c   : >> { %1998 = vmatmul.mubr.msk.bf16.vlgmr.msra.gmra.mrb[20].mxu1 %vm814_vm4, %v1272_v20  ;;  %2027 = vmatprep.subr.bf16.mxu0 %v2258_v6 }
 0x84d   : >> { %2008 = vmatpush3.bf16.msra.mxu1 %v1393_v46  ;;  %v1366_v21 = vpop.f32.mrb[16].mxu0  ;;  %2009 = vmatprep.mubr.msk.bf16.mxu1 %vm2259_vm2, %v2258_v6 }
 0x84e   : >> { %v1367_v45 = vadd.f32 %v2578_v44, %v1366_v21  ;;  %v2005_v48 = vpop.f32.mrb[17].mxu0  ;;  %2019 = vmatprep.subr.bf16.mxu1 %v2258_v6 }
 0x84f   : >> { %v1369_v49 = vpop.f32.mrb[18].mxu0 }
 0x850   : >> { %v1370_v50 = vadd.f32 %v2578_v44, %v1369_v49  ;;  %v2006_v51 = vpop.f32.mrb[19].mxu0  ;;  %v1373_v52 = vsel %vm634_vm0, %v1367_v45, -inf }
 0x851   : >> { %1374 = vmax.xlane.f32.xlu0 %v1373_v52 }
 0x852   : >> { %v1376_v53 = vsel %vm634_vm0, %v1370_v50, -inf }
 0x855   : >> { %1377 = vmax.xlane.f32.xlu0 %v1376_v53 }
 0x8de   : >> { %v1375_v54 = vpop.xlane.xlu0 %1374 }
 0x8df   : >> { %v1379_v55 = vsub.f32 %v1367_v45, %v1375_v54 }
 0x8e1   : >> { %v1381_v56 = vmul.f32 1.442695, %v1379_v55 }
 0x8e2   : >> { %v1378_v57 = vpop.xlane.xlu0 %1377 }
 0x8e3   : >> { %2148 = vpow2.f32 %v1381_v56  ;;  %v1380_v58 = vsub.f32 %v1370_v50, %v1378_v57 }
 0x8e5   : >> { %v1383_v47 = vmul.f32 1.442695, %v1380_v58 }
 0x8e7   : >> { %2150 = vpow2.f32 %v1383_v47 }
 0x8ed   : >> { %v2149_v59 = vpop.eup %2148 }
 0x8ee   : >> { %v1385_v60 = vsel %vm634_vm0, %v2149_v59, 0.0 }
 0x8ef   : >> { %1386 = vadd.xlane.f32.xlu0 %v1385_v60 }
 0x8f1   : >> { %v2151_v61 = vpop.eup %2150 }
 0x8f2   : >> { %v1388_v62 = vsel %vm634_vm0, %v2151_v61, 0.0  ;;  %v1391_v63 = vpack.c.bf16 %v2151_v61, %v2149_v59 }
 0x8f3   : >> { %1389 = vadd.xlane.f32.xlu0 %v1388_v62 }
 0x8f4   : >> { %2010 = vmatmul.mubr.msk.bf16.vlgmr.msra.gmra.mrb[24].mxu1 %vm634_vm0, %v1391_v63 }
 0x8f5   : >> { %2023 = vmatprep.mubr.msk.bf16.mxu1 %vm2259_vm2, %v2258_v6 }
 0x91f   : >> { %v1313_v1 = vpop.f32.mrb[20].mxu1 }
 0x920   : >> { %v1320_v4 = vadd.f32 %v1313_v1, %v2686_v2  ;;  %v1999_v7 = vpop.f32.mrb[21].mxu1 }
 0x921   : >> { %v1316_v9 = vpop.f32.mrb[22].mxu1 }
 0x922   : >> { %v1321_v10 = vadd.f32 %v1316_v9, %v2688_v8  ;;  %v2000_v11 = vpop.f32.mrb[23].mxu1 }
 0x97c   : >> { %v1387_v5 = vpop.xlane.xlu0 %1386 }
 0x97d   : >> { %2152 = vrcp.f32 %v1387_v5  ;;  %v1880_v5 = vcombine.low %v2508_v30, %v2513_v31 }
 0x980   : >> { %v1390_v13 = vpop.xlane.xlu0 %1389 }
 0x981   : >> { %2154 = vrcp.f32 %v1390_v13 }
 0x987   : >> { %v2153_v46 = vpop.eup %2152 }
 0x98b   : >> { %v2155_v45 = vpop.eup %2154 }
 0x9c7   : >> { %v1432_v20 = vpop.f32.mrb[24].mxu1 }
 0x9c8   : >> { %v2011_v21 = vpop.f32.mrb[25].mxu1  ;;  %v1440_v48 = vmul.f32 %v2153_v46, %v1432_v20 }
 0x9c9   : >> { %v1435_v2 = vpop.f32.mrb[26].mxu1 }
 0x9ca   : >> { %v1442_v49 = vmul.f32 %v2155_v45, %v1435_v2  ;;  %v2012_v50 = vpop.f32.mrb[27].mxu1 }
 0x9cc   : >> { %v1443_v8 = vpack.c.bf16 %v1442_v49, %v1440_v48 }
 0x9ce   : >> { %2016 = vmatmul.mubr.msk.bf16.vlgmr.msra.gmra.mrb[20].mxu0 %vm814_vm4, %v1443_v8 }
 0x9cf   : >> { %2035 = vmatprep.mubr.msk.bf16.mxu0 %vm2259_vm2, %v2258_v6 }
 0xaa1   : >> { %v1484_v51 = vpop.f32.mrb[20].mxu0 }
 0xaa2   : >> { %v1491_v52 = vadd.f32 %v1484_v51, %v1320_v4  ;;  %v2017_v53 = vpop.f32.mrb[21].mxu0 }
 0xaa3   : >> { %v1487_v54 = vpop.f32.mrb[22].mxu0 }
 0xaa4   : >> { %v1499_v55 = vadd.f32 %v2483_v25, %v1491_v52  ;;  %v1492_v56 = vadd.f32 %v1487_v54, %v1321_v10  ;;  %v2018_v57 = vpop.f32.mrb[23].mxu0 }
 0xaa5   : >> { %v1884_v57 = vcombine.low %v2536_v35, %v2541_v36 }
 0xaa6   : >> { %v1500_v58 = vadd.f32 %v2483_v25, %v1492_v56  ;;  %v1501_v47 = vadd.f32 %v2250_v0, %v1499_v55  ;;  %v1883_v56 = vcombine.low %v2526_v33, %v2531_v34 }
 0xaa8   : >> { %v1503_v59 = vsel %vm762_vm3, %v1501_v47, 0.0  ;;  %v1502_v60 = vadd.f32 %v2246_v3, %v1500_v58  ;;  %v1879_v3 = vcombine.low %v2498_v28, %v2503_v29  ;;  %2028 = vmatpush3.bf16.msra.mxu0 %v1883_v56  ;;  %v1885_v58 = vcombine.low %v2546_v37, %v2551_v38 }
 0xaa9   : >> { %1504 = vadd.xlane.f32.xlu0 %v1503_v59  ;;  %2029 = vmatprep.subr.bf16.mxu0 %v2258_v6 }
 0xaaa   : >> { %v1506_v61 = vsel %vm762_vm3, %v1502_v60, 0.0  ;;  %2020 = vmatpush3.bf16.msra.mxu1 %v1879_v3 }
 0xaab   : >> { %2021 = vmatprep.subr.bf16.mxu1 %v2258_v6 }
 0xaac   : >> { %2030 = vmatpush3.bf16.msra.mxu0 %v1884_v57 }
 0xaad   : >> { %1507 = vadd.xlane.f32.xlu0 %v1506_v61  ;;  %2031 = vmatprep.subr.bf16.mxu0 %v2258_v6 }
 0xaae   : >> { %2022 = vmatpush3.bf16.msra.mxu1 %v1880_v5 }
 0xab0   : >> { %2032 = vmatpush3.bf16.msra.mxu0 %v1885_v58 }
 0xab1   : >> { %2033 = vmatprep.subr.bf16.mxu0 %v2258_v6 }
 0xb36   : >> { %v1505_v62 = vpop.xlane.xlu0 %1504 }
 0xb37   : >> { %v1510_v63 = vmul.f32 0.03125, %v1505_v62 }
 0xb39   : >> { %v1512_v1 = vsub.f32 %v1501_v47, %v1510_v63  ;;  %v1886_v47 = vcombine.low %v2556_v39, %v2561_v40 }
 0xb3a   : >> { %v1508_v4 = vpop.xlane.xlu0 %1507 }
 0xb3b   : >> { %v1511_v7 = vmul.f32 0.03125, %v1508_v4  ;;  %v1514_v9 = vmul.f32 %v1512_v1, %v1512_v1  ;;  %2034 = vmatpush3.bf16.msra.mxu0 %v1886_v47 }
 0xb3d   : >> { %v1513_v10 = vsub.f32 %v1502_v60, %v1511_v7  ;;  %v1516_v11 = vsel %vm762_vm3, %v1514_v9, 0.0 }
 0xb3e   : >> { %1517 = vadd.xlane.f32.xlu1 %v1516_v11 }
 0xb3f   : >> { %v1515_v12 = vmul.f32 %v1513_v10, %v1513_v10 }
 0xb41   : >> { %v1519_v0 = vsel %vm762_vm3, %v1515_v12, 0.0 }
 0xb42   : >> { %1520 = vadd.xlane.f32.xlu0 %v1519_v0 }
 0xbcb   : >> { %v1518_v13 = vpop.xlane.xlu1 %1517 }
 0xbcc   : >> { %v1522_v20 = vmul.f32 0.03125, %v1518_v13 }
 0xbce   : >> { %v1524_v46 = vadd.f32 1e-12, %v1522_v20 }
 0xbcf   : >> { %v1521_v21 = vpop.xlane.xlu0 %1520 }
 0xbd0   : >> { %2156 = vrsqrt.f32 %v1524_v46  ;;  %v1523_v45 = vmul.f32 0.03125, %v1521_v21 }
 0xbd2   : >> { %v1525_v2 = vadd.f32 1e-12, %v1523_v45 }
 0xbd4   : >> { %2158 = vrsqrt.f32 %v1525_v2 }
 0xbda   : >> { %v2157_v48 = vpop.eup %2156 }
 0xbdb   : >> { %v1528_v49 = vmul.f32 %v2157_v48, %v1512_v1 }
 0xbdd   : >> { %v1536_v8 = vmul.f32 %v2488_v26, %v1528_v49 }
 0xbde   : >> { %v2159_v50 = vpop.eup %2158 }
 0xbdf   : >> { %v1529_v51 = vmul.f32 %v2159_v50, %v1513_v10  ;;  %v1544_v53 = vadd.f32 %v2493_v27, %v1536_v8 }
 0xbe1   : >> { %v1537_v52 = vmul.f32 %v2488_v26, %v1529_v51 }
 0xbe3   : >> { %v1545_v54 = vadd.f32 %v2493_v27, %v1537_v52 }
 0xbe5   : >> { %v1546_v55 = vpack.c.bf16 %v1545_v54, %v1544_v53 }
 0xbe7   : >> { %2024 = vmatmul.mubr.msk.bf16.vlgmr.msra.gmra.mrb[28].mxu1 %vm762_vm3, %v1546_v55 }
 0xcba   : >> { %v1602_v59 = vpop.f32.mrb[28].mxu1 }
 0xcbb   : >> { %v1603_v60 = vadd.f32 %v2518_v32, %v1602_v59  ;;  %v2025_v61 = vpop.f32.mrb[29].mxu1 }
 0xcbc   : >> { %v1605_v62 = vpop.f32.mrb[30].mxu1 }
 0xcbd   : >> { %v1609_v63 = vmul.f32 %v1603_v60, %v1603_v60  ;;  %v1606_v1 = vadd.f32 %v2518_v32, %v1605_v62  ;;  %v2026_v4 = vpop.f32.mrb[31].mxu1 }
 0xcbf   : >> { %v1611_v7 = vmul.f32 %v1609_v63, %v1603_v60  ;;  %v1610_v9 = vmul.f32 %v1606_v1, %v1606_v1 }
 0xcc1   : >> { %v1613_v10 = vmul.f32 0.044715, %v1611_v7  ;;  %v1612_v11 = vmul.f32 %v1610_v9, %v1606_v1 }
 0xcc3   : >> { %v1615_v12 = vadd.f32 %v1613_v10, %v1603_v60  ;;  %v1614_v0 = vmul.f32 0.044715, %v1612_v11 }
 0xcc5   : >> { %v1617_v6 = vmul.f32 0.7978846, %v1615_v12  ;;  %v1616_v3 = vadd.f32 %v1614_v0, %v1606_v1 }
 0xcc7   : >> { %2160 = vtanh.f32 %v1617_v6  ;;  %v1618_v5 = vmul.f32 0.7978846, %v1616_v3 }
 0xcc9   : >> { %2162 = vtanh.f32 %v1618_v5 }
 0xcd1   : >> { %v2161_v13 = vpop.eup %2160 }
 0xcd2   : >> { %v1621_v20 = vadd.f32 1.0, %v2161_v13 }
 0xcd3   : >> { %v2163_v46 = vpop.eup %2162 }
 0xcd4   : >> { %v1623_v21 = vmul.f32 0.5, %v1621_v20  ;;  %v1622_v45 = vadd.f32 1.0, %v2163_v46 }
 0xcd6   : >> { %v1624_v2 = vmul.f32 0.5, %v1622_v45  ;;  %v1625_v48 = vmul.f32 %v1623_v21, %v1603_v60 }
 0xcd8   : >> { %v1626_v49 = vmul.f32 %v1624_v2, %v1606_v1 }
 0xcda   : >> { %v1627_v50 = vpack.c.bf16 %v1626_v49, %v1625_v48 }
 0xcdc   : >> { %2036 = vmatmul.mubr.msk.bf16.vlgmr.msra.gmra.mrb[24].mxu0 %vm1658_vm6, %v1627_v50 }
 0xdaf   : >> { %v1696_v8 = vpop.f32.mrb[24].mxu0 }
 0xdb0   : >> { %v1697_v51 = vadd.f32 %v2566_v41, %v1696_v8  ;;  %v2037_v52 = vpop.f32.mrb[25].mxu0 }
 0xdb1   : >> { %v1699_v55 = vpop.f32.mrb[26].mxu0 }
 0xdb2   : >> { %v1700_v56 = vadd.f32 %v2566_v41, %v1699_v55  ;;  %v2038_v57 = vpop.f32.mrb[27].mxu0  ;;  %v1703_v58 = vadd.f32 %v1697_v51, %v1544_v53 }
 0xdb4   : >> { %v1705_v47 = vsel %vm762_vm3, %v1703_v58, 0.0  ;;  %v1704_v59 = vadd.f32 %v1700_v56, %v1545_v54 }
 0xdb5   : >> { %1706 = vadd.xlane.f32.xlu0 %v1705_v47 }
 0xdb6   : >> { %v1708_v61 = vsel %vm762_vm3, %v1704_v59, 0.0 }
 0xdb9   : >> { %1709 = vadd.xlane.f32.xlu0 %v1708_v61 }
 0xe42   : >> { %v1707_v60 = vpop.xlane.xlu0 %1706 }
 0xe43   : >> { %v1711_v62 = vmul.f32 0.03125, %v1707_v60 }
 0xe45   : >> { %v1713_v63 = vsub.f32 %v1703_v58, %v1711_v62 }
 0xe46   : >> { %v1710_v1 = vpop.xlane.xlu0 %1709 }
 0xe47   : >> { %v1712_v4 = vmul.f32 0.03125, %v1710_v1  ;;  %v1715_v7 = vmul.f32 %v1713_v63, %v1713_v63 }
 0xe49   : >> { %v1714_v9 = vsub.f32 %v1704_v59, %v1712_v4  ;;  %v1717_v10 = vsel %vm762_vm3, %v1715_v7, 0.0 }
 0xe4a   : >> { %1718 = vadd.xlane.f32.xlu0 %v1717_v10 }
 0xe4b   : >> { %v1716_v11 = vmul.f32 %v1714_v9, %v1714_v9 }
 0xe4d   : >> { %v1720_v53 = vsel %vm762_vm3, %v1716_v11, 0.0 }
 0xe4e   : >> { %1721 = vadd.xlane.f32.xlu0 %v1720_v53 }
 0xed7   : >> { %v1719_v12 = vpop.xlane.xlu0 %1718 }
 0xed8   : >> { %v1723_v54 = vmul.f32 0.03125, %v1719_v12 }
 0xeda   : >> { %v1725_v0 = vadd.f32 1e-12, %v1723_v54 }
 0xedb   : >> { %v1722_v6 = vpop.xlane.xlu0 %1721 }
 0xedc   : >> { %2164 = vrsqrt.f32 %v1725_v0  ;;  %v1724_v3 = vmul.f32 0.03125, %v1722_v6 }
 0xede   : >> { %v1726_v5 = vadd.f32 1e-12, %v1724_v3 }
 0xee0   : >> { %2166 = vrsqrt.f32 %v1726_v5 }
 0xee6   : >> { %v2165_v13 = vpop.eup %2164 }
 0xee7   : >> { %v1729_v20 = vmul.f32 %v2165_v13, %v1713_v63 }
 0xee9   : >> { %v1737_v46 = vmul.f32 %v2571_v42, %v1729_v20 }
 0xeea   : >> { %v2167_v21 = vpop.eup %2166 }
 0xeeb   : >> { %v1745_v45 = vadd.f32 %v2576_v43, %v1737_v46   ;;  %v1730_v2 = vmul.f32 %v2167_v21, %v1714_v9  ;;  %739 = sbr.rel (!%p737_p12) target bundleno = 570 (0x23a), region = 137 }
 0xeed   : >> { %v1738_v48 = vmul.f32 %v2571_v42, %v1730_v2  ;;  %v2882_v0 = vmov %v1745_v45  ;;  %1748 = vst.msk [vmem:[%s2591_s29] sm:$0xff] (%p737_p12), %vm762_vm3, %v1745_v45 }
 0xeef   : >> { %v1746_v49 = vadd.f32 %v2576_v43, %v1738_v48  }
 0xef1   : >> { %v2881_v3 = vmov %v1746_v49  ;;  %1749 = vst.msk [vmem:[%s2591_s29 + $0x8] sm:$0xff] (%p737_p12), %vm762_vm3, %v1746_v49 }
 0xef2   : > { %2181 = shalt.err (!%p2178_p7)
}
 0xef3   : > { %s2182_s29 = scalar_lea.hbm %s2789_s23, 256  ;;  %s2186_s19 = scalar_lea.hbm %s2855_s18, 512 }
 0xef4   : > { %p2183_p8 = scmp.ne.s32.totalorder %s2789_s23, %s2182_s29  ;;  %p2187_p11 = scmp.lt.u32.totalorder %s2789_s23, %s2855_s18 }
 0xef5   : > { %p2188_p12 = scmp.lt.u32.totalorder %s2186_s19, %s2182_s29  ;;  %p2190_p0 = scmp.lt.u32.totalorder %s2182_s29, %s2789_s23 }
 0xef6   : > { %p2184_p9 = pnand %p2183_p8, %p2407_p5 }
 0xef7   : > { %p2189_p13 = por %p2188_p12, %p2187_p11 }
 0xef8   : > { %p2185_p10 = pneg %p2184_p9 }
 0xef9   : > { %p2191_p1 = por %p2190_p0, %p2189_p13 }
 0xefb   : > { %p2192_p2 = pnand %p2191_p1, %p2185_p10 }
 0xefd   : > { %2195 = shalt.err (!%p2192_p2)
}
 0xefe   : > { %s2272_s1 = smov 128   ;;  %s2273_s22 = smov 8  }
 0xeff   : > { %2039 = dma.vmem_to_hbm [thread:$0]  (%p2407_p5), %s2792_s24, 256, %s2789_s23, %s2796_s25, %s2272_s1, %s2272_s1, %s2273_s22  }
 0xf00 PF: > { %p2045_p3 = scmp.ge.s32.totalorder %s2242_s30, 2  ;;  %s1779_s0 = sand.u32 1, %s2230_s27  }
 0xf01   : > { %s1780_s8 = scalar_lea.sflag [#allocation3], %s1779_s0 }
 0xf02   : > { %p2042_p4 = pnand %p2045_p3, %p2411_p6 }
 0xf04   : > { %2225 = dma.done.wait (!%p2042_p4), %s1780_s8, 256  }
 0xf05   : > { %2227 = vsyncadd (!%p2042_p4), %s1780_s8, 4294967040  ;;  %s2885_s30 = sld [smem:[#allocation6_spill]]  ;;  %s2886_s26 = sld [smem:[#allocation5_spill]] }
 0xf06   : > { %s2887_s29 = sld [smem:[#allocation7_spill]]  ;;  %s2888_s27 = smov %s2234_s28 }
 0xf0b   : > { %p28_p7 = scmp.ge.s32.totalorder %s2885_s30, 4   ;;  %s2889_s28 = smov %s2886_s26 }
 0xf0d   :  { %30 = sbr.rel (!%p28_p7) target bundleno = 11 (0xb), region = 148 }
 0xf14   :  { %1785 = vsyncpa [#allocation3], 1 }
 0xf15   :  { %1787 = vsyncpa [#allocation3 + $0x1], 1 }

</bundles_post_ra>
